<compile_context>
chip_gen: v7x
topology: tpu7x:2x2x1
jax: 0.10.0
libtpu: 0.0.40
codegen_flags: <defaults>
</compile_context>

<pallas_src>
import functools

import jax
import jax.numpy as jnp
from jax.experimental import pallas as pl
from jax.experimental.pallas import tpu as pltpu

EPS = 1e-5
LANE = 128


# ----------------------------- layout helpers -------------------------------
def _round_up(v, m):
    return ((v + m - 1) // m) * m


def _cdiv(a, b):
    return (a + b - 1) // b


def _m_layout(M):
    """(padded M, M tile): tile rows so VMEM blocks stay ~1 MiB and the grid
    has many "parallel" steps; a single tile for small M."""
    Mp = _round_up(max(M, 16), 16)
    if Mp <= 512:
        return Mp, Mp
    tm = 256
    return _round_up(M, tm), tm


def _n_tile(Np, m_tiles):
    """Output-channel tile: prefer 256 (v6e MXU is 2x256^2); if the M axis has
    only one tile, split N so the grid still has >=2 parallel steps (v7x)."""
    if m_tiles == 1 and Np >= 256:
        return 128
    return 256 if Np % 256 == 0 else 128


def _k_tile(K):
    """K is a multiple of 128 (channels pre-padded).  Single reduction step up
    to K=2048 (fits VMEM on v5e/v6e/v7x at tm<=256); otherwise the largest
    512/256/128 tile dividing K."""
    if K <= 2048:
        return K
    for tk in (512, 256, 128):
        if K % tk == 0:
            return tk
    return 128


# ----------------------------- matmul kernels --------------------------------
def _mm_kernel_single(x_ref, w_ref, s_ref, b_ref, *rest, relu, has_res):
    """out = act((x @ w) * scale + bias [+ residual]); single K step, 1 store."""
    if has_res:
        r_ref, o_ref = rest
    else:
        (o_ref,) = rest
    acc = jnp.dot(x_ref[...], w_ref[...], preferred_element_type=jnp.float32)
    y = acc * s_ref[...] + b_ref[...]
    if has_res:
        y = y + r_ref[...].astype(jnp.float32)
    if relu:
        y = jnp.maximum(y, 0.0)
    o_ref[...] = y.astype(o_ref.dtype)


def _mm_kernel_multi(x_ref, w_ref, s_ref, b_ref, *rest, relu, has_res):
    """K-tiled variant: f32 VMEM scratch accumulator, epilogue on last K step."""
    if has_res:
        r_ref, o_ref, acc_ref = rest
    else:
        o_ref, acc_ref = rest
    k = pl.program_id(2)
    part = jnp.dot(x_ref[...], w_ref[...], preferred_element_type=jnp.float32)

    @pl.when(k == 0)
    def _():
        acc_ref[...] = part            # direct write: no zero-init RMW

    @pl.when(k != 0)
    def _():
        acc_ref[...] += part

    @pl.when(k == pl.num_programs(2) - 1)
    def _():
        y = acc_ref[...] * s_ref[...] + b_ref[...]
        if has_res:
            y = y + r_ref[...].astype(jnp.float32)
        if relu:
            y = jnp.maximum(y, 0.0)
        o_ref[...] = y.astype(o_ref.dtype)


def matmul_bn_act(x, fold, residual=None, relu=True):
    """x:(M,K) bf16 @ pre-folded weights, fused BN scale/bias + residual + ReLU.
    Returns (M, Npad) bf16 (output channels stay padded for layer chaining)."""
    M, K = x.shape
    wmat, scale, bias = fold["wmat"], fold["scale"], fold["bias"]
    assert wmat.shape[0] == K, (wmat.shape, K)
    Np = wmat.shape[1]

    Mp, tm = _m_layout(M)
    m_tiles = Mp // tm
    tn = _n_tile(Np, m_tiles)
    tk = _k_tile(K)
    nk = K // tk

    if Mp != M:
        x = jnp.pad(x, ((0, Mp - M), (0, 0)))
    has_res = residual is not None
    if has_res:
        assert residual.shape == (M, Np), (residual.shape, (M, Np))
        residual = residual.astype(jnp.bfloat16)
        if Mp != M:
            residual = jnp.pad(residual, ((0, Mp - M), (0, 0)))

    if nk == 1:
        grid = (m_tiles, Np // tn)
        in_specs = [
            pl.BlockSpec((tm, K), lambda m, n: (m, 0)),     # activations bf16
            pl.BlockSpec((K, tn), lambda m, n: (0, n)),     # weights bf16
            pl.BlockSpec((1, tn), lambda m, n: (0, n)),     # BN scale f32
            pl.BlockSpec((1, tn), lambda m, n: (0, n)),     # BN bias  f32
        ]
        if has_res:
            in_specs.append(pl.BlockSpec((tm, tn), lambda m, n: (m, n)))
        out_spec = pl.BlockSpec((tm, tn), lambda m, n: (m, n))
        kernel = functools.partial(_mm_kernel_single, relu=relu, has_res=has_res)
        scratch = []
        sem = ("parallel", "parallel")
    else:
        grid = (m_tiles, Np // tn, nk)                      # k innermost
        in_specs = [
            pl.BlockSpec((tm, tk), lambda m, n, k: (m, k)),
            pl.BlockSpec((tk, tn), lambda m, n, k: (k, n)),
            pl.BlockSpec((1, tn), lambda m, n, k: (0, n)),
            pl.BlockSpec((1, tn), lambda m, n, k: (0, n)),
        ]
        if has_res:
            in_specs.append(pl.BlockSpec((tm, tn), lambda m, n, k: (m, n)))
        out_spec = pl.BlockSpec((tm, tn), lambda m, n, k: (m, n))
        kernel = functools.partial(_mm_kernel_multi, relu=relu, has_res=has_res)
        scratch = [pltpu.VMEM((tm, tn), jnp.float32)]
        sem = ("parallel", "parallel", "arbitrary")

    args = [x, wmat, scale, bias] + ([residual] if has_res else [])
    out = pl.pallas_call(
        kernel,
        out_shape=jax.ShapeDtypeStruct((Mp, Np), jnp.bfloat16),
        grid_spec=pltpu.PrefetchScalarGridSpec(
            num_scalar_prefetch=0,
            grid=grid,
            in_specs=in_specs,
            out_specs=out_spec,
            scratch_shapes=scratch),
        compiler_params=pltpu.CompilerParams(dimension_semantics=sem),
    )(*args)
    return out[:M] if Mp != M else out


# ----------------------------- fused 3x3 conv --------------------------------
def _conv3x3_kernel(xa_ref, xb_ref, w_ref, s_ref, b_ref, o_ref, *, offs):
    """im2col-free 3x3 conv: 9 statically shifted dot-products over flattened
    spatially-padded rows, fused with BN scale/bias + ReLU."""
    tm = o_ref.shape[0]
    cp = xa_ref.shape[1]
    xcat = jnp.concatenate([xa_ref[...], xb_ref[...]], axis=0)   # (tm + th, Cp)
    acc = None
    for t, off in enumerate(offs):                               # unrolled: 9 taps
        xs = xcat[off:off + tm, :]
        part = jnp.dot(xs, w_ref[t * cp:(t + 1) * cp, :],
                       preferred_element_type=jnp.float32)
        acc = part if acc is None else acc + part
    y = jnp.maximum(acc * s_ref[...] + b_ref[...], 0.0)
    o_ref[...] = y.astype(o_ref.dtype)


def conv3x3_bn_relu(x, fold):
    """Conv2d(3x3, stride 1, pad 1, bias=False) -> BN -> ReLU, no HBM im2col.

    x: (N, H, W, Cp) bf16, channels already padded to a multiple of 128.  The
    spatially padded image is flattened to rows; tap (dy,dx) of output pixel
    (h,w) lives at flat offset dy*(W+2)+dx from the pixel's top-left corner,
    so the conv becomes 9 shifted matmuls on VMEM-resident row tiles (plus a
    small halo block).  Rows falling in the pad band compute garbage and are
    sliced away afterwards.
    """
    N, H, W, Cp = x.shape
    Hp, Wp = H + 2, W + 2
    S = Hp * Wp
    Np = fold["wmat"].shape[1]
    assert fold["wmat"].shape[0] == 9 * Cp, (fold["wmat"].shape, Cp)

    xf = jnp.pad(x, ((0, 0), (1, 1), (1, 1), (0, 0))).reshape(N * S, Cp)

    halo = 2 * Wp + 2                              # max tap offset
    th = _round_up(halo, 16)                       # halo block rows
    tm = th * max(1, 256 // th)                    # row tile (multiple of th)
    Mo = N * S
    m_tiles = _cdiv(Mo, tm)
    Lp = (m_tiles + 1) * tm                        # room for the trailing halo
    xf = jnp.pad(xf, ((0, Lp - Mo), (0, 0)))

    tn = _n_tile(Np, m_tiles)
    if Cp >= 1024:
        tn = 128                                   # bound the full-K weight block
    r = tm // th
    offs = tuple(dy * Wp + dx for dy in range(3) for dx in range(3))

    out = pl.pallas_call(
        functools.partial(_conv3x3_kernel, offs=offs),
        out_shape=jax.ShapeDtypeStruct((m_tiles * tm, Np), jnp.bfloat16),
        grid_spec=pltpu.PrefetchScalarGridSpec(
            num_scalar_prefetch=0,
            grid=(m_tiles, Np // tn),
            in_specs=[
                pl.BlockSpec((tm, Cp), lambda m, n: (m, 0)),            # rows
                pl.BlockSpec((th, Cp), lambda m, n: ((m + 1) * r, 0)),  # halo
                pl.BlockSpec((9 * Cp, tn), lambda m, n: (0, n)),        # weights
                pl.BlockSpec((1, tn), lambda m, n: (0, n)),             # BN scale
                pl.BlockSpec((1, tn), lambda m, n: (0, n)),             # BN bias
            ],
            out_specs=pl.BlockSpec((tm, tn), lambda m, n: (m, n))),
        compiler_params=pltpu.CompilerParams(
            dimension_semantics=("parallel", "parallel")),
    )(xf, xf, fold["wmat"], fold["scale"], fold["bias"])
    return out[:Mo].reshape(N, Hp, Wp, Np)[:, :H, :W, :]


# ----------------------------- 1x1 conv glue ---------------------------------
def conv1x1_bn(x, fold, stride=1, relu=True, residual=None):
    """Conv2d(1x1, bias=False) -> BN [-> +residual] [-> ReLU] as one matmul."""
    if stride != 1:
        x = x[:, ::stride, ::stride, :]
    N, H, W, Cp = x.shape
    M = N * H * W
    res2d = None
    if residual is not None:
        # Same shape requirement as the PyTorch reference's `out += residual`.
        assert residual.shape[:3] == (N, H, W), (residual.shape, (N, H, W))
        res2d = residual.reshape(M, residual.shape[3])
    out = matmul_bn_act(x.reshape(M, Cp), fold, residual=res2d, relu=relu)
    return out.reshape(N, H, W, out.shape[1])


def residual_block(x, fp, downsample):
    """Faithful ResidualBlock.forward on padded-channel bf16 NHWC activations."""
    out = conv1x1_bn(x, fp["conv1"], relu=True)            # conv1 -> bn1 -> relu
    out = conv3x3_bn_relu(out, fp["conv2"])                 # conv2 -> bn2 -> relu
    if downsample:
        residual = conv1x1_bn(x, fp["short"], stride=2, relu=False)
    else:
        residual = x
    # conv3 -> bn3 -> (+residual) -> relu, fused in one kernel epilogue.
    return conv1x1_bn(out, fp["conv3"], relu=True, residual=residual)


def forward(fp, downsample, x_nchw):
    """NCHW f32 in, NCHW f32 out; everything in between is padded-channel bf16."""
    x = jnp.transpose(x_nchw, (0, 2, 3, 1))                 # NCHW -> NHWC
    in_c = x.shape[-1]
    cin_p = fp["conv1"]["wmat"].shape[0]                    # padded input channels
    x = jnp.pad(x, ((0, 0), (0, 0), (0, 0), (0, cin_p - in_c))).astype(jnp.bfloat16)
    y = residual_block(x, fp, downsample)
    y = y[..., :fp["conv3"]["out_c"]].astype(jnp.float32)
    return jnp.transpose(y, (0, 3, 1, 2))                   # NHWC -> NCHW


# ----------------------------- parameters ------------------------------------
def build_block_params(key, in_c, mid_c, out_c, downsample):
    keys = iter(jax.random.split(key, 32))

    def conv_bn_p(o, i, kh, kw):
        fan_in = float(i * kh * kw)
        w = jax.random.normal(next(keys), (o, i, kh, kw),
                              jnp.float32) / (fan_in ** 0.5)
        gamma = 1.0 + 0.05 * jax.random.normal(next(keys), (o,), jnp.float32)
        beta = 0.05 * jax.random.normal(next(keys), (o,), jnp.float32)
        mean = 0.05 * jax.random.normal(next(keys), (o,), jnp.float32)
        var = 1.0 + 0.05 * jnp.abs(
            jax.random.normal(next(keys), (o,), jnp.float32))
        return {"w": w, "gamma": gamma, "beta": beta, "mean": mean, "var": var}

    p = {"conv1": conv_bn_p(mid_c, in_c, 1, 1),
         "conv2": conv_bn_p(mid_c, mid_c, 3, 3),
         "conv3": conv_bn_p(out_c, mid_c, 1, 1)}
    if downsample:
        p["short"] = conv_bn_p(out_c, in_c, 1, 1)
    return p


def fold_conv_bn(p, eps=EPS):
    """One-time prep: OIHW -> (kh*kw*Cpad_in, Npad) bf16, BN -> f32 scale/bias.

    K rows already account for the *padded* input-channel layout, so bf16
    activations chained between layers need no per-call re-pad / re-cast."""
    w = p["w"]
    O, I, kh, kw = w.shape
    Ip = _round_up(I, LANE)
    Np = _round_up(O, LANE)
    wt = jnp.transpose(w, (2, 3, 1, 0))                     # (kh, kw, I, O)
    wt = jnp.pad(wt, ((0, 0), (0, 0), (0, Ip - I), (0, Np - O)))
    scale = p["gamma"] / jnp.sqrt(p["var"] + eps)
    bias = p["beta"] - scale * p["mean"]
    return {
        "wmat": wt.reshape(kh * kw * Ip, Np).astype(jnp.bfloat16),
        "scale": jnp.pad(scale, (0, Np - O)).reshape(1, Np).astype(jnp.float32),
        "bias": jnp.pad(bias, (0, Np - O)).reshape(1, Np).astype(jnp.float32),
        "out_c": O,
    }


def fold_block_params(p):
    return {name: fold_conv_bn(cp) for name, cp in p.items()}


# ----------------------------- pure-JAX reference -----------------------------
def _ref_conv_bn(x, p, stride, pad, relu, residual=None, eps=EPS):
    w = jnp.transpose(p["w"], (2, 3, 1, 0))                 # OIHW -> HWIO
    y = jax.lax.conv_general_dilated(
        x, w, window_strides=(stride, stride),
        padding=((pad, pad), (pad, pad)),
        dimension_numbers=("NHWC", "HWIO", "NHWC"))
    scale = p["gamma"] / jnp.sqrt(p["var"] + eps)
    y = y * scale + (p["beta"] - scale * p["mean"])
    if residual is not None:
        y = y + residual
    if relu:
        y = jnp.maximum(y, 0.0)
    return y


def _ref_block(x_nchw, p, downsample):
    x = jnp.transpose(x_nchw, (0, 2, 3, 1)).astype(jnp.float32)
    out = _ref_conv_bn(x, p["conv1"], 1, 0, True)
    out = _ref_conv_bn(out, p["conv2"], 1, 1, True)
    res = _ref_conv_bn(x, p["short"], 2, 0, False) if downsample else x
    out = _ref_conv_bn(out, p["conv3"], 1, 0, True, residual=res)
    return jnp.transpose(out, (0, 3, 1, 2))


# ----------------------------- main -------------------------------------------
if __name__ == "__main__":
    key = jax.random.PRNGKey(0)
    k_p1, k_p2, k_x1, k_x2 = jax.random.split(key, 4)

    # Case 1: identity shortcut (in_channels == out_channels) — the regime in
    # which the reference's `out += residual` is shape-consistent.
    raw1 = build_block_params(k_p1, 256, 64, 256, downsample=False)
    fp1 = fold_block_params(raw1)
    x1 = jax.random.normal(k_x1, (2, 256, 8, 8), jnp.float32)
    fwd1 = jax.jit(functools.partial(forward, fp1, False))
    y1 = jax.block_until_ready(fwd1(x1))
    assert y1.shape == (2, 256, 8, 8), y1.shape
    assert bool(jnp.all(jnp.isfinite(y1)))
    r1 = _ref_block(x1, raw1, downsample=False)
    err1 = float(jnp.max(jnp.abs(y1 - r1)) / (jnp.max(jnp.abs(r1)) + 1e-6))
    assert err1 < 4e-2, err1     # bf16 MXU inputs + bf16 layer chaining, f32 acc

    # Case 2: projection shortcut (downsample=True).
    # TODO(synk): the reference's stride-2 shortcut vs stride-1 main path is
    # only shape-consistent for 1x1 spatial input (larger inputs raise in
    # PyTorch), so that is the regime exercised here.
    raw2 = build_block_params(k_p2, 256, 128, 512, downsample=True)
    fp2 = fold_block_params(raw2)
    x2 = jax.random.normal(k_x2, (2, 256, 1, 1), jnp.float32)
    fwd2 = jax.jit(functools.partial(forward, fp2, True))
    y2 = jax.block_until_ready(fwd2(x2))
    assert y2.shape == (2, 512, 1, 1), y2.shape
    assert bool(jnp.all(jnp.isfinite(y2)))
    r2 = _ref_block(x2, raw2, downsample=True)
    err2 = float(jnp.max(jnp.abs(y2 - r2)) / (jnp.max(jnp.abs(r2)) + 1e-6))
    assert err2 < 4e-2, err2

    print("KERNEL_OK")
</pallas_src>

<mosaic_0001>
module attributes {stable_mosaic.version = 11 : i64} {
  func.func @_mm_kernel_single(%arg0: i32, %arg1: i32, %arg2: memref<128x256xbf16, #tpu.memory_space<vmem>>, %arg3: memref<256x128xbf16, #tpu.memory_space<vmem>>, %arg4: memref<1x128xf32, #tpu.memory_space<vmem>>, %arg5: memref<1x128xf32, #tpu.memory_space<vmem>>, %arg6: memref<128x128xbf16, #tpu.memory_space<vmem>>) attributes {dimension_semantics = [#tpu.dimension_semantics<parallel>, #tpu.dimension_semantics<parallel>], iteration_bounds = array<i64: 1, 1>, scalar_prefetch = 0 : i64, scratch_operands = 0 : i64, tpu.core_type = #tpu.core_type<tc>, window_params = [{transform_indices = @transform_0, window_bounds = array<i64: 128, 256>}, {transform_indices = @transform_1, window_bounds = array<i64: 256, 128>}, {transform_indices = @transform_2, window_bounds = array<i64: 1, 128>}, {transform_indices = @transform_3, window_bounds = array<i64: 1, 128>}, {transform_indices = @transform_4, window_bounds = array<i64: 128, 128>}]} {
    %c0 = arith.constant 0 : index
    %c0_0 = arith.constant 0 : index
    %0 = vector.load %arg2[%c0, %c0_0] : memref<128x256xbf16, #tpu.memory_space<vmem>>, vector<128x256xbf16>
    %c0_1 = arith.constant 0 : index
    %c0_2 = arith.constant 0 : index
    %1 = vector.load %arg3[%c0_1, %c0_2] : memref<256x128xbf16, #tpu.memory_space<vmem>>, vector<256x128xbf16>
    %cst = arith.constant dense<0.000000e+00> : vector<128x128xf32>
    %2 = tpu.matmul %0, %1, %cst {dimension_numbers = #tpu.dot_dimension_numbers<[1], [0], [0], [1], [0, 0, 1, 1], [], []>} : vector<128x256xbf16>, vector<256x128xbf16>, vector<128x128xf32> -> vector<128x128xf32>
    %c0_3 = arith.constant 0 : index
    %c0_4 = arith.constant 0 : index
    %3 = vector.load %arg4[%c0_3, %c0_4] : memref<1x128xf32, #tpu.memory_space<vmem>>, vector<1x128xf32>
    %4 = vector.broadcast %3 : vector<1x128xf32> to vector<128x128xf32>
    %5 = arith.mulf %2, %4 : vector<128x128xf32>
    %c0_5 = arith.constant 0 : index
    %c0_6 = arith.constant 0 : index
    %6 = vector.load %arg5[%c0_5, %c0_6] : memref<1x128xf32, #tpu.memory_space<vmem>>, vector<1x128xf32>
    %7 = vector.broadcast %6 : vector<1x128xf32> to vector<128x128xf32>
    %8 = arith.addf %5, %7 : vector<128x128xf32>
    %cst_7 = arith.constant 0.000000e+00 : f32
    %9 = vector.broadcast %cst_7 : f32 to vector<128x128xf32>
    %10 = arith.maximumf %8, %9 : vector<128x128xf32>
    %11 = arith.truncf %10 : vector<128x128xf32> to vector<128x128xbf16>
    %c0_8 = arith.constant 0 : index
    %c0_9 = arith.constant 0 : index
    %12 = vector.load %arg6[%c0_8, %c0_9] : memref<128x128xbf16, #tpu.memory_space<vmem>>, vector<128x128xbf16>
    tpu.vector_store %arg6[%c0_8, %c0_9], %11 {strides = array<i32>} : memref<128x128xbf16, #tpu.memory_space<vmem>>, vector<128x128xbf16>,
    return
  }
  func.func @transform_0(%arg0: i32, %arg1: i32) -> (i32, i32) {
    %c0_i32 = arith.constant 0 : i32
    %c0_i32_0 = arith.constant 0 : i32
    return %arg0, %c0_i32 : i32, i32
  }
  func.func @transform_1(%arg0: i32, %arg1: i32) -> (i32, i32) {
    %c0_i32 = arith.constant 0 : i32
    %c0_i32_0 = arith.constant 0 : i32
    return %c0_i32, %arg1 : i32, i32
  }
  func.func @transform_2(%arg0: i32, %arg1: i32) -> (i32, i32) {
    %c0_i32 = arith.constant 0 : i32
    %c0_i32_0 = arith.constant 0 : i32
    return %c0_i32, %arg1 : i32, i32
  }
  func.func @transform_3(%arg0: i32, %arg1: i32) -> (i32, i32) {
    %c0_i32 = arith.constant 0 : i32
    %c0_i32_0 = arith.constant 0 : i32
    return %c0_i32, %arg1 : i32, i32
  }
  func.func @transform_4(%arg0: i32, %arg1: i32) -> (i32, i32) {
    %c0_i32 = arith.constant 0 : i32
    return %arg0, %arg1 : i32, i32
  }
}

module attributes {stable_mosaic.version = 11 : i64} {
  func.func @_conv3x3_kernel(%arg0: i32, %arg1: i32, %arg2: memref<256x128xbf16, #tpu.memory_space<vmem>>, %arg3: memref<32x128xbf16, #tpu.memory_space<vmem>>, %arg4: memref<1152x128xbf16, #tpu.memory_space<vmem>>, %arg5: memref<1x128xf32, #tpu.memory_space<vmem>>, %arg6: memref<1x128xf32, #tpu.memory_space<vmem>>, %arg7: memref<256x128xbf16, #tpu.memory_space<vmem>>) attributes {dimension_semantics = [#tpu.dimension_semantics<parallel>, #tpu.dimension_semantics<parallel>], iteration_bounds = array<i64: 1, 1>, scalar_prefetch = 0 : i64, scratch_operands = 0 : i64, tpu.core_type = #tpu.core_type<tc>, window_params = [{transform_indices = @transform_0, window_bounds = array<i64: 256, 128>}, {transform_indices = @transform_1, window_bounds = array<i64: 32, 128>}, {transform_indices = @transform_2, window_bounds = array<i64: 1152, 128>}, {transform_indices = @transform_3, window_bounds = array<i64: 1, 128>}, {transform_indices = @transform_4, window_bounds = array<i64: 1, 128>}, {transform_indices = @transform_5, window_bounds = array<i64: 256, 128>}]} {
    %c0 = arith.constant 0 : index
    %c0_0 = arith.constant 0 : index
    %0 = vector.load %arg2[%c0, %c0_0] : memref<256x128xbf16, #tpu.memory_space<vmem>>, vector<256x128xbf16>
    %c0_1 = arith.constant 0 : index
    %c0_2 = arith.constant 0 : index
    %1 = vector.load %arg3[%c0_1, %c0_2] : memref<32x128xbf16, #tpu.memory_space<vmem>>, vector<32x128xbf16>
    %2 = tpu.concatenate %0, %1 in 0 : vector<256x128xbf16>, vector<32x128xbf16> -> vector<288x128xbf16>
    %3 = vector.extract_strided_slice %2 {offsets = [0, 0], sizes = [256, 128], strides = [1, 1]} : vector<288x128xbf16> to vector<256x128xbf16>
    %c0_3 = arith.constant 0 : index
    %c0_4 = arith.constant 0 : index
    %4 = vector.load %arg4[%c0_3, %c0_4] : memref<1152x128xbf16, #tpu.memory_space<vmem>>, vector<128x128xbf16>
    %cst = arith.constant dense<0.000000e+00> : vector<256x128xf32>
    %5 = tpu.matmul %3, %4, %cst {dimension_numbers = #tpu.dot_dimension_numbers<[1], [0], [0], [1], [0, 0, 1, 1], [], []>} : vector<256x128xbf16>, vector<128x128xbf16>, vector<256x128xf32> -> vector<256x128xf32>
    %6 = vector.extract_strided_slice %2 {offsets = [1, 0], sizes = [256, 128], strides = [1, 1]} : vector<288x128xbf16> to vector<256x128xbf16>
    %c128 = arith.constant 128 : index
    %c0_5 = arith.constant 0 : index
    %7 = vector.load %arg4[%c128, %c0_5] : memref<1152x128xbf16, #tpu.memory_space<vmem>>, vector<128x128xbf16>
    %cst_6 = arith.constant dense<0.000000e+00> : vector<256x128xf32>
    %8 = tpu.matmul %6, %7, %cst_6 {dimension_numbers = #tpu.dot_dimension_numbers<[1], [0], [0], [1], [0, 0, 1, 1], [], []>} : vector<256x128xbf16>, vector<128x128xbf16>, vector<256x128xf32> -> vector<256x128xf32>
    %9 = arith.addf %5, %8 : vector<256x128xf32>
    %10 = vector.extract_strided_slice %2 {offsets = [2, 0], sizes = [256, 128], strides = [1, 1]} : vector<288x128xbf16> to vector<256x128xbf16>
    %c256 = arith.constant 256 : index
    %c0_7 = arith.constant 0 : index
    %11 = vector.load %arg4[%c256, %c0_7] : memref<1152x128xbf16, #tpu.memory_space<vmem>>, vector<128x128xbf16>
    %cst_8 = arith.constant dense<0.000000e+00> : vector<256x128xf32>
    %12 = tpu.matmul %10, %11, %cst_8 {dimension_numbers = #tpu.dot_dimension_numbers<[1], [0], [0], [1], [0, 0, 1, 1], [], []>} : vector<256x128xbf16>, vector<128x128xbf16>, vector<256x128xf32> -> vector<256x128xf32>
    %13 = arith.addf %9, %12 : vector<256x128xf32>
    %14 = vector.extract_strided_slice %2 {offsets = [10, 0], sizes = [256, 128], strides = [1, 1]} : vector<288x128xbf16> to vector<256x128xbf16>
    %c384 = arith.constant 384 : index
    %c0_9 = arith.constant 0 : index
    %15 = vector.load %arg4[%c384, %c0_9] : memref<1152x128xbf16, #tpu.memory_space<vmem>>, vector<128x128xbf16>
    %cst_10 = arith.constant dense<0.000000e+00> : vector<256x128xf32>
    %16 = tpu.matmul %14, %15, %cst_10 {dimension_numbers = #tpu.dot_dimension_numbers<[1], [0], [0], [1], [0, 0, 1, 1], [], []>} : vector<256x128xbf16>, vector<128x128xbf16>, vector<256x128xf32> -> vector<256x128xf32>
    %17 = arith.addf %13, %16 : vector<256x128xf32>
    %18 = vector.extract_strided_slice %2 {offsets = [11, 0], sizes = [256, 128], strides = [1, 1]} : vector<288x128xbf16> to vector<256x128xbf16>
    %c512 = arith.constant 512 : index
    %c0_11 = arith.constant 0 : index
    %19 = vector.load %arg4[%c512, %c0_11] : memref<1152x128xbf16, #tpu.memory_space<vmem>>, vector<128x128xbf16>
    %cst_12 = arith.constant dense<0.000000e+00> : vector<256x128xf32>
    %20 = tpu.matmul %18, %19, %cst_12 {dimension_numbers = #tpu.dot_dimension_numbers<[1], [0], [0], [1], [0, 0, 1, 1], [], []>} : vector<256x128xbf16>, vector<128x128xbf16>, vector<256x128xf32> -> vector<256x128xf32>
    %21 = arith.addf %17, %20 : vector<256x128xf32>
    %22 = vector.extract_strided_slice %2 {offsets = [12, 0], sizes = [256, 128], strides = [1, 1]} : vector<288x128xbf16> to vector<256x128xbf16>
    %c640 = arith.constant 640 : index
    %c0_13 = arith.constant 0 : index
    %23 = vector.load %arg4[%c640, %c0_13] : memref<1152x128xbf16, #tpu.memory_space<vmem>>, vector<128x128xbf16>
    %cst_14 = arith.constant dense<0.000000e+00> : vector<256x128xf32>
    %24 = tpu.matmul %22, %23, %cst_14 {dimension_numbers = #tpu.dot_dimension_numbers<[1], [0], [0], [1], [0, 0, 1, 1], [], []>} : vector<256x128xbf16>, vector<128x128xbf16>, vector<256x128xf32> -> vector<256x128xf32>
    %25 = arith.addf %21, %24 : vector<256x128xf32>
    %26 = vector.extract_strided_slice %2 {offsets = [20, 0], sizes = [256, 128], strides = [1, 1]} : vector<288x128xbf16> to vector<256x128xbf16>
    %c768 = arith.constant 768 : index
    %c0_15 = arith.constant 0 : index
    %27 = vector.load %arg4[%c768, %c0_15] : memref<1152x128xbf16, #tpu.memory_space<vmem>>, vector<128x128xbf16>
    %cst_16 = arith.constant dense<0.000000e+00> : vector<256x128xf32>
    %28 = tpu.matmul %26, %27, %cst_16 {dimension_numbers = #tpu.dot_dimension_numbers<[1], [0], [0], [1], [0, 0, 1, 1], [], []>} : vector<256x128xbf16>, vector<128x128xbf16>, vector<256x128xf32> -> vector<256x128xf32>
    %29 = arith.addf %25, %28 : vector<256x128xf32>
    %30 = vector.extract_strided_slice %2 {offsets = [21, 0], sizes = [256, 128], strides = [1, 1]} : vector<288x128xbf16> to vector<256x128xbf16>
    %c896 = arith.constant 896 : index
    %c0_17 = arith.constant 0 : index
    %31 = vector.load %arg4[%c896, %c0_17] : memref<1152x128xbf16, #tpu.memory_space<vmem>>, vector<128x128xbf16>
    %cst_18 = arith.constant dense<0.000000e+00> : vector<256x128xf32>
    %32 = tpu.matmul %30, %31, %cst_18 {dimension_numbers = #tpu.dot_dimension_numbers<[1], [0], [0], [1], [0, 0, 1, 1], [], []>} : vector<256x128xbf16>, vector<128x128xbf16>, vector<256x128xf32> -> vector<256x128xf32>
    %33 = arith.addf %29, %32 : vector<256x128xf32>
    %34 = vector.extract_strided_slice %2 {offsets = [22, 0], sizes = [256, 128], strides = [1, 1]} : vector<288x128xbf16> to vector<256x128xbf16>
    %c1024 = arith.constant 1024 : index
    %c0_19 = arith.constant 0 : index
    %35 = vector.load %arg4[%c1024, %c0_19] : memref<1152x128xbf16, #tpu.memory_space<vmem>>, vector<128x128xbf16>
    %cst_20 = arith.constant dense<0.000000e+00> : vector<256x128xf32>
    %36 = tpu.matmul %34, %35, %cst_20 {dimension_numbers = #tpu.dot_dimension_numbers<[1], [0], [0], [1], [0, 0, 1, 1], [], []>} : vector<256x128xbf16>, vector<128x128xbf16>, vector<256x128xf32> -> vector<256x128xf32>
    %37 = arith.addf %33, %36 : vector<256x128xf32>
    %c0_21 = arith.constant 0 : index
    %c0_22 = arith.constant 0 : index
    %38 = vector.load %arg5[%c0_21, %c0_22] : memref<1x128xf32, #tpu.memory_space<vmem>>, vector<1x128xf32>
    %39 = vector.broadcast %38 : vector<1x128xf32> to vector<256x128xf32>
    %40 = arith.mulf %37, %39 : vector<256x128xf32>
    %c0_23 = arith.constant 0 : index
    %c0_24 = arith.constant 0 : index
    %41 = vector.load %arg6[%c0_23, %c0_24] : memref<1x128xf32, #tpu.memory_space<vmem>>, vector<1x128xf32>
    %42 = vector.broadcast %41 : vector<1x128xf32> to vector<256x128xf32>
    %43 = arith.addf %40, %42 : vector<256x128xf32>
    %cst_25 = arith.constant 0.000000e+00 : f32
    %44 = vector.broadcast %cst_25 : f32 to vector<256x128xf32>
    %45 = arith.maximumf %43, %44 : vector<256x128xf32>
    %46 = arith.truncf %45 : vector<256x128xf32> to vector<256x128xbf16>
    %c0_26 = arith.constant 0 : index
    %c0_27 = arith.constant 0 : index
    %47 = vector.load %arg7[%c0_26, %c0_27] : memref<256x128xbf16, #tpu.memory_space<vmem>>, vector<256x128xbf16>
    tpu.vector_store %arg7[%c0_26, %c0_27], %46 {strides = array<i32>} : memref<256x128xbf16, #tpu.memory_space<vmem>>, vector<256x128xbf16>,
    return
  }
  func.func @transform_0(%arg0: i32, %arg1: i32) -> (i32, i32) {
    %c0_i32 = arith.constant 0 : i32
    %c0_i32_0 = arith.constant 0 : i32
    return %arg0, %c0_i32 : i32, i32
  }
  func.func @transform_1(%arg0: i32, %arg1: i32) -> (i32, i32) {
    %c1_i32 = arith.constant 1 : i32
    %0 = arith.addi %arg0, %c1_i32 : i32
    %c8_i32 = arith.constant 8 : i32
    %1 = arith.muli %0, %c8_i32 : i32
    %c0_i32 = arith.constant 0 : i32
    %c0_i32_0 = arith.constant 0 : i32
    return %1, %c0_i32 : i32, i32
  }
  func.func @transform_2(%arg0: i32, %arg1: i32) -> (i32, i32) {
    %c0_i32 = arith.constant 0 : i32
    %c0_i32_0 = arith.constant 0 : i32
    return %c0_i32, %arg1 : i32, i32
  }
  func.func @transform_3(%arg0: i32, %arg1: i32) -> (i32, i32) {
    %c0_i32 = arith.constant 0 : i32
    %c0_i32_0 = arith.constant 0 : i32
    return %c0_i32, %arg1 : i32, i32
  }
  func.func @transform_4(%arg0: i32, %arg1: i32) -> (i32, i32) {
    %c0_i32 = arith.constant 0 : i32
    %c0_i32_0 = arith.constant 0 : i32
    return %c0_i32, %arg1 : i32, i32
  }
  func.func @transform_5(%arg0: i32, %arg1: i32) -> (i32, i32) {
    %c0_i32 = arith.constant 0 : i32
    return %arg0, %arg1 : i32, i32
  }
}

module attributes {stable_mosaic.version = 11 : i64} {
  func.func @_mm_kernel_single(%arg0: i32, %arg1: i32, %arg2: memref<128x128xbf16, #tpu.memory_space<vmem>>, %arg3: memref<128x128xbf16, #tpu.memory_space<vmem>>, %arg4: memref<1x128xf32, #tpu.memory_space<vmem>>, %arg5: memref<1x128xf32, #tpu.memory_space<vmem>>, %arg6: memref<128x128xbf16, #tpu.memory_space<vmem>>, %arg7: memref<128x128xbf16, #tpu.memory_space<vmem>>) attributes {dimension_semantics = [#tpu.dimension_semantics<parallel>, #tpu.dimension_semantics<parallel>], iteration_bounds = array<i64: 1, 2>, scalar_prefetch = 0 : i64, scratch_operands = 0 : i64, tpu.core_type = #tpu.core_type<tc>, window_params = [{transform_indices = @transform_0, window_bounds = array<i64: 128, 128>}, {transform_indices = @transform_1, window_bounds = array<i64: 128, 128>}, {transform_indices = @transform_2, window_bounds = array<i64: 1, 128>}, {transform_indices = @transform_3, window_bounds = array<i64: 1, 128>}, {transform_indices = @transform_4, window_bounds = array<i64: 128, 128>}, {transform_indices = @transform_5, window_bounds = array<i64: 128, 128>}]} {
    %c0 = arith.constant 0 : index
    %c0_0 = arith.constant 0 : index
    %0 = vector.load %arg2[%c0, %c0_0] : memref<128x128xbf16, #tpu.memory_space<vmem>>, vector<128x128xbf16>
    %c0_1 = arith.constant 0 : index
    %c0_2 = arith.constant 0 : index
    %1 = vector.load %arg3[%c0_1, %c0_2] : memref<128x128xbf16, #tpu.memory_space<vmem>>, vector<128x128xbf16>
    %cst = arith.constant dense<0.000000e+00> : vector<128x128xf32>
    %2 = tpu.matmul %0, %1, %cst {dimension_numbers = #tpu.dot_dimension_numbers<[1], [0], [0], [1], [0, 0, 1, 1], [], []>} : vector<128x128xbf16>, vector<128x128xbf16>, vector<128x128xf32> -> vector<128x128xf32>
    %c0_3 = arith.constant 0 : index
    %c0_4 = arith.constant 0 : index
    %3 = vector.load %arg4[%c0_3, %c0_4] : memref<1x128xf32, #tpu.memory_space<vmem>>, vector<1x128xf32>
    %4 = vector.broadcast %3 : vector<1x128xf32> to vector<128x128xf32>
    %5 = arith.mulf %2, %4 : vector<128x128xf32>
    %c0_5 = arith.constant 0 : index
    %c0_6 = arith.constant 0 : index
    %6 = vector.load %arg5[%c0_5, %c0_6] : memref<1x128xf32, #tpu.memory_space<vmem>>, vector<1x128xf32>
    %7 = vector.broadcast %6 : vector<1x128xf32> to vector<128x128xf32>
    %8 = arith.addf %5, %7 : vector<128x128xf32>
    %c0_7 = arith.constant 0 : index
    %c0_8 = arith.constant 0 : index
    %9 = vector.load %arg6[%c0_7, %c0_8] : memref<128x128xbf16, #tpu.memory_space<vmem>>, vector<128x128xbf16>
    %10 = arith.extf %9 : vector<128x128xbf16> to vector<128x128xf32>
    %11 = arith.addf %8, %10 : vector<128x128xf32>
    %cst_9 = arith.constant 0.000000e+00 : f32
    %12 = vector.broadcast %cst_9 : f32 to vector<128x128xf32>
    %13 = arith.maximumf %11, %12 : vector<128x128xf32>
    %14 = arith.truncf %13 : vector<128x128xf32> to vector<128x128xbf16>
    %c0_10 = arith.constant 0 : index
    %c0_11 = arith.constant 0 : index
    %15 = vector.load %arg7[%c0_10, %c0_11] : memref<128x128xbf16, #tpu.memory_space<vmem>>, vector<128x128xbf16>
    tpu.vector_store %arg7[%c0_10, %c0_11], %14 {strides = array<i32>} : memref<128x128xbf16, #tpu.memory_space<vmem>>, vector<128x128xbf16>,
    return
  }
  func.func @transform_0(%arg0: i32, %arg1: i32) -> (i32, i32) {
    %c0_i32 = arith.constant 0 : i32
    %c0_i32_0 = arith.constant 0 : i32
    return %arg0, %c0_i32 : i32, i32
  }
  func.func @transform_1(%arg0: i32, %arg1: i32) -> (i32, i32) {
    %c0_i32 = arith.constant 0 : i32
    %c0_i32_0 = arith.constant 0 : i32
    return %c0_i32, %arg1 : i32, i32
  }
  func.func @transform_2(%arg0: i32, %arg1: i32) -> (i32, i32) {
    %c0_i32 = arith.constant 0 : i32
    %c0_i32_0 = arith.constant 0 : i32
    return %c0_i32, %arg1 : i32, i32
  }
  func.func @transform_3(%arg0: i32, %arg1: i32) -> (i32, i32) {
    %c0_i32 = arith.constant 0 : i32
    %c0_i32_0 = arith.constant 0 : i32
    return %c0_i32, %arg1 : i32, i32
  }
  func.func @transform_4(%arg0: i32, %arg1: i32) -> (i32, i32) {
    %c0_i32 = arith.constant 0 : i32
    return %arg0, %arg1 : i32, i32
  }
  func.func @transform_5(%arg0: i32, %arg1: i32) -> (i32, i32) {
    %c0_i32 = arith.constant 0 : i32
    return %arg0, %arg1 : i32, i32
  }
}

</mosaic_0001>

<bundles_post_ra>
// kernel: forward.3
= control target key start
LH: loop header
LB: loop body
LE: loop exit
PB: predicated region body
PF: predicated region fallthrough
CT: control target
= control target key end

     0   :  { %s905_s1 = inlined_call_operand.vmem [shape: bf16[256,128], index: 1, kind: input, shape index: {}]   ;;  %s906_s0 = inlined_call_operand.vmem [shape: bf16[128,256], index: 0, kind: input, shape index: {}]   ;;  %s907_s2 = inlined_call_operand.vmem [shape: f32[1,128], index: 2, kind: input, shape index: {}]   ;;  %s908_s3 = inlined_call_operand.vmem [shape: f32[1,128], index: 3, kind: input, shape index: {}]   ;;  %s909_s4 = inlined_call_operand.vmem [shape: bf16[128,128], index: 4, kind: output, shape index: {}]  }
   0x1   :  { %v678_v0 = vld [vmem:[%s905_s1 + $0x40] sm:$0xff]   ;;  %v680_v2 = vld [vmem:[%s905_s1 + $0x48] sm:$0xff]   ;;  %v682_v4 = vld [vmem:[%s905_s1 + $0x50] sm:$0xff]  }
   0x2   :  { %v679_v1 = vld [vmem:[%s905_s1] sm:$0xff]   ;;  %598 = vmatprep.subr.bf16.mxu0 %v678_v0  ;;  %662 = vmatprep.subr.bf16.mxu1 %v678_v0  ;;  %v681_v3 = vld [vmem:[%s905_s1 + $0x8] sm:$0xff]   ;;  %v683_v5 = vld [vmem:[%s905_s1 + $0x10] sm:$0xff]  }
   0x3   :  { %599 = vmatpush3.bf16.msra.mxu0 %v679_v1  ;;  %670 = vmatpush3.bf16.msra.mxu1 %v679_v1  ;;  %v684_v6 = vld [vmem:[%s905_s1 + $0x58] sm:$0xff]   ;;  %v686_v8 = vld [vmem:[%s905_s1 + $0x60] sm:$0xff]   ;;  %v688_v10 = vld [vmem:[%s905_s1 + $0x68] sm:$0xff]  }
   0x4   :  { %600 = vmatprep.subr.bf16.mxu0 %v680_v2  ;;  %663 = vmatprep.subr.bf16.mxu1 %v680_v2  ;;  %v685_v7 = vld [vmem:[%s905_s1 + $0x18] sm:$0xff]   ;;  %v687_v9 = vld [vmem:[%s905_s1 + $0x20] sm:$0xff]   ;;  %v689_v13 = vld [vmem:[%s905_s1 + $0x28] sm:$0xff]  }
   0x5   :  { %v696_v11 = vld [vmem:[%s906_s0 + $0x4] ss:$8 sps:$4 sm:$0xff]   ;;  %v690_v14 = vld [vmem:[%s905_s1 + $0x70] sm:$0xff]   ;;  %v692_v16 = vld [vmem:[%s905_s1 + $0x78] sm:$0xff]  }
   0x6   :  { %v699_v12 = vld [vmem:[%s906_s0 + $0x44] ss:$8 sps:$4 sm:$0xff]   ;;  %274 = vmatprep.mubr.bf16.mxu0 %v696_v11  ;;  %v691_v15 = vld [vmem:[%s905_s1 + $0x30] sm:$0xff]   ;;  %v693_v17 = vld [vmem:[%s905_s1 + $0x38] sm:$0xff]  }
   0x7   :  { %601 = vmatpush3.bf16.msra.mxu0 %v681_v3  ;;  %671 = vmatpush3.bf16.msra.mxu1 %v681_v3  ;;  %v694_v18 = vld [vmem:[%s906_s0] ss:$8 sps:$4 sm:$0xff]   ;;  %v700_v20 = vld [vmem:[%s906_s0 + $0x14] ss:$8 sps:$4 sm:$0xff]   ;;  %v704_v22 = vld [vmem:[%s906_s0 + $0x10] ss:$8 sps:$4 sm:$0xff]  }
   0x8   :  { %602 = vmatprep.subr.bf16.mxu0 %v682_v4  ;;  %664 = vmatprep.subr.bf16.mxu1 %v682_v4  ;;  %v697_v19 = vld [vmem:[%s906_s0 + $0x40] ss:$8 sps:$4 sm:$0xff]   ;;  %v702_v21 = vld [vmem:[%s906_s0 + $0x54] ss:$8 sps:$4 sm:$0xff]   ;;  %v705_v23 = vld [vmem:[%s906_s0 + $0x50] ss:$8 sps:$4 sm:$0xff]  }
   0x9   :  { %306 = vmatprep.mubr.bf16.mxu1 %v699_v12  ;;  %v706_v24 = vld [vmem:[%s906_s0 + $0x24] ss:$8 sps:$4 sm:$0xff]   ;;  %v710_v26 = vld [vmem:[%s906_s0 + $0x20] ss:$8 sps:$4 sm:$0xff]   ;;  %v712_v28 = vld [vmem:[%s906_s0 + $0x34] ss:$8 sps:$4 sm:$0xff]  }
   0xa   :  { %v708_v25 = vld [vmem:[%s906_s0 + $0x64] ss:$8 sps:$4 sm:$0xff]   ;;  %v711_v27 = vld [vmem:[%s906_s0 + $0x60] ss:$8 sps:$4 sm:$0xff]   ;;  %v714_v29 = vld [vmem:[%s906_s0 + $0x74] ss:$8 sps:$4 sm:$0xff]  }
   0xb   :  { %603 = vmatpush3.bf16.msra.mxu0 %v683_v5  ;;  %672 = vmatpush3.bf16.msra.mxu1 %v683_v5  ;;  %v716_v30 = vld [vmem:[%s906_s0 + $0x30] ss:$8 sps:$4 sm:$0xff]   ;;  %v842_v35 = vld [vmem:[%s907_s2] ss:$0 sm:$0xff] }
   0xc   :  { %604 = vmatprep.subr.bf16.mxu0 %v684_v6  ;;  %665 = vmatprep.subr.bf16.mxu1 %v684_v6  ;;  %v717_v31 = vld [vmem:[%s906_s0 + $0x70] ss:$8 sps:$4 sm:$0xff]   ;;  %v847_v41 = vld [vmem:[%s908_s3] ss:$0 sm:$0xff] }
   0xf   :  { %605 = vmatpush3.bf16.msra.mxu0 %v685_v7  ;;  %673 = vmatpush3.bf16.msra.mxu1 %v685_v7 }
  0x10   :  { %606 = vmatprep.subr.bf16.mxu0 %v686_v8  ;;  %666 = vmatprep.subr.bf16.mxu1 %v686_v8 }
  0x13   :  { %607 = vmatpush3.bf16.msra.mxu0 %v687_v9  ;;  %674 = vmatpush3.bf16.msra.mxu1 %v687_v9 }
  0x14   :  { %608 = vmatprep.subr.bf16.mxu0 %v688_v10  ;;  %667 = vmatprep.subr.bf16.mxu1 %v688_v10 }
  0x17   :  { %609 = vmatpush3.bf16.msra.mxu0 %v689_v13  ;;  %675 = vmatpush3.bf16.msra.mxu1 %v689_v13 }
  0x18   :  { %610 = vmatprep.subr.bf16.mxu0 %v690_v14  ;;  %668 = vmatprep.subr.bf16.mxu1 %v690_v14 }
  0x1b   :  { %611 = vmatpush3.bf16.msra.mxu0 %v691_v15  ;;  %676 = vmatpush3.bf16.msra.mxu1 %v691_v15 }
  0x1c   :  { %612 = vmatprep.subr.bf16.mxu0 %v692_v16  ;;  %669 = vmatprep.subr.bf16.mxu1 %v692_v16 }
  0x1f   :  { %613 = vmatpush3.bf16.msra.mxu0 %v693_v17  ;;  %677 = vmatpush3.bf16.msra.mxu1 %v693_v17 }
  0x22   :  { %275 = vmatmul.mubr.bf16.vlgmr.msra.gmra.mrb[0].mxu0 %v694_v18  ;;  %307 = vmatmul.mubr.bf16.vlgmr.msra.gmra.mrb[0].mxu1 %v697_v19 }
  0x23   :  { %282 = vmatprep.mubr.bf16.mxu0 %v700_v20  ;;  %314 = vmatprep.mubr.bf16.mxu1 %v702_v21 }
  0x2a   :  { %283 = vmatmul.mubr.bf16.gmra.mrb[4].mxu0 %v704_v22  ;;  %315 = vmatmul.mubr.bf16.gmra.mrb[4].mxu1 %v705_v23 }
  0x2b   :  { %290 = vmatprep.mubr.bf16.mxu0 %v706_v24  ;;  %322 = vmatprep.mubr.bf16.mxu1 %v708_v25 }
  0x32   :  { %291 = vmatmul.mubr.bf16.gmra.mrb[8].mxu0 %v710_v26  ;;  %323 = vmatmul.mubr.bf16.gmra.mrb[8].mxu1 %v711_v27 }
  0x33   :  { %298 = vmatprep.mubr.bf16.mxu0 %v712_v28  ;;  %330 = vmatprep.mubr.bf16.mxu1 %v714_v29 }
  0x3a   :  { %299 = vmatmul.mubr.bf16.gmra.mrb[12].mxu0 %v716_v30  ;;  %331 = vmatmul.mubr.bf16.gmra.mrb[12].mxu1 %v717_v31 }
  0xf5   :  { %v614_v32 = vpop.f32.mrb[0].mxu0  ;;  %v638_v33 = vpop.f32.mrb[0].mxu1 }
  0xf6   :  { %v615_v34 = vpop.f32.mrb[1].mxu0  ;;  %v639_v36 = vpop.f32.mrb[1].mxu1 }
  0xf7   :  { %v616_v37 = vadd.f32 %v615_v34, %v614_v32  ;;  %v640_v38 = vadd.f32 %v639_v36, %v638_v33  ;;  %v617_v39 = vpop.f32.mrb[2].mxu0  ;;  %v641_v40 = vpop.f32.mrb[2].mxu1 }
  0xf8   :  { %v618_v42 = vpop.f32.mrb[3].mxu0  ;;  %v642_v43 = vpop.f32.mrb[3].mxu1 }
  0xf9   :  { %v346_v44 = vmul.f32 %v616_v37, %v842_v35  ;;  %v354_v45 = vmul.f32 %v640_v38, %v842_v35  ;;  %v619_v46 = vadd.f32 %v618_v42, %v617_v39  ;;  %v643_v47 = vadd.f32 %v642_v43, %v641_v40 }
  0xfb   :  { %v369_v48 = vadd.f32 %v847_v41, %v346_v44  ;;  %v377_v49 = vadd.f32 %v847_v41, %v354_v45  ;;  %v347_v50 = vmul.f32 %v619_v46, %v842_v35  ;;  %v355_v51 = vmul.f32 %v643_v47, %v842_v35 }
  0xfd   :  { %v370_v52 = vadd.f32 %v847_v41, %v347_v50  ;;  %v378_v53 = vadd.f32 %v847_v41, %v355_v51  ;;  %v620_v54 = vpop.f32.mrb[4].mxu0  ;;  %v644_v55 = vpop.f32.mrb[4].mxu1  ;;  %v385_v56 = vmax.f32 %v369_v48, 0.0  ;;  %v393_v57 = vmax.f32 %v377_v49, 0.0 }
  0xfe   :  { %v621_v58 = vpop.f32.mrb[5].mxu0  ;;  %v645_v59 = vpop.f32.mrb[5].mxu1 }
  0xff   :  { %v386_v60 = vmax.f32 %v370_v52, 0.0  ;;  %v394_v61 = vmax.f32 %v378_v53, 0.0  ;;  %v622_v62 = vadd.f32 %v621_v58, %v620_v54  ;;  %v646_v63 = vadd.f32 %v645_v59, %v644_v55  ;;  %v623_v0 = vpop.f32.mrb[6].mxu0  ;;  %v647_v1 = vpop.f32.mrb[6].mxu1 }
 0x100   :  { %v624_v2 = vpop.f32.mrb[7].mxu0  ;;  %v648_v3 = vpop.f32.mrb[7].mxu1 }
 0x101   :  { %v554_v4 = vpack.c.bf16 %v386_v60, %v385_v56  ;;  %v574_v5 = vpack.c.bf16 %v394_v61, %v393_v57  ;;  %v348_v6 = vmul.f32 %v622_v62, %v842_v35  ;;  %v356_v7 = vmul.f32 %v646_v63, %v842_v35 }
 0x102   :  { %v625_v8 = vadd.f32 %v624_v2, %v623_v0  ;;  %v649_v9 = vadd.f32 %v648_v3, %v647_v1 }
 0x103   :  { %555 = vst [vmem:[%s909_s4] sm:$0xff] %v554_v4   ;;  %594 = vst [vmem:[%s909_s4 + $0x20] sm:$0xff] %v574_v5   ;;  %v371_v10 = vadd.f32 %v847_v41, %v348_v6  ;;  %v379_v11 = vadd.f32 %v847_v41, %v356_v7 }
 0x104   :  { %v349_v12 = vmul.f32 %v625_v8, %v842_v35  ;;  %v357_v13 = vmul.f32 %v649_v9, %v842_v35 }
 0x105   :  { %v626_v14 = vpop.f32.mrb[8].mxu0  ;;  %v650_v15 = vpop.f32.mrb[8].mxu1  ;;  %v387_v24 = vmax.f32 %v371_v10, 0.0  ;;  %v395_v25 = vmax.f32 %v379_v11, 0.0 }
 0x106   :  { %v372_v16 = vadd.f32 %v847_v41, %v349_v12  ;;  %v380_v17 = vadd.f32 %v847_v41, %v357_v13  ;;  %v627_v18 = vpop.f32.mrb[9].mxu0  ;;  %v651_v19 = vpop.f32.mrb[9].mxu1 }
 0x107   :  { %v628_v20 = vadd.f32 %v627_v18, %v626_v14  ;;  %v652_v21 = vadd.f32 %v651_v19, %v650_v15  ;;  %v629_v22 = vpop.f32.mrb[10].mxu0  ;;  %v653_v23 = vpop.f32.mrb[10].mxu1 }
 0x108   :  { %v388_v26 = vmax.f32 %v372_v16, 0.0  ;;  %v396_v27 = vmax.f32 %v380_v17, 0.0  ;;  %v630_v28 = vpop.f32.mrb[11].mxu0  ;;  %v654_v29 = vpop.f32.mrb[11].mxu1 }
 0x109   :  { %v350_v30 = vmul.f32 %v628_v20, %v842_v35  ;;  %v358_v31 = vmul.f32 %v652_v21, %v842_v35  ;;  %v631_v32 = vadd.f32 %v630_v28, %v629_v22  ;;  %v655_v33 = vadd.f32 %v654_v29, %v653_v23 }
 0x10a   :  { %v559_v34 = vpack.c.bf16 %v388_v26, %v387_v24  ;;  %v579_v36 = vpack.c.bf16 %v396_v27, %v395_v25 }
 0x10b   :  { %v373_v37 = vadd.f32 %v847_v41, %v350_v30  ;;  %v381_v38 = vadd.f32 %v847_v41, %v358_v31  ;;  %v351_v39 = vmul.f32 %v631_v32, %v842_v35  ;;  %v359_v40 = vmul.f32 %v655_v33, %v842_v35 }
 0x10c   :  { %591 = vst [vmem:[%s909_s4 + $0x8] sm:$0xff] %v559_v34   ;;  %595 = vst [vmem:[%s909_s4 + $0x28] sm:$0xff] %v579_v36  }
 0x10d   :  { %v374_v42 = vadd.f32 %v847_v41, %v351_v39  ;;  %v382_v43 = vadd.f32 %v847_v41, %v359_v40  ;;  %v632_v44 = vpop.f32.mrb[12].mxu0  ;;  %v656_v45 = vpop.f32.mrb[12].mxu1  ;;  %v389_v46 = vmax.f32 %v373_v37, 0.0  ;;  %v397_v47 = vmax.f32 %v381_v38, 0.0 }
 0x10e   :  { %v633_v48 = vpop.f32.mrb[13].mxu0  ;;  %v657_v49 = vpop.f32.mrb[13].mxu1 }
 0x10f   :  { %v390_v50 = vmax.f32 %v374_v42, 0.0  ;;  %v398_v51 = vmax.f32 %v382_v43, 0.0  ;;  %v634_v52 = vadd.f32 %v633_v48, %v632_v44  ;;  %v658_v53 = vadd.f32 %v657_v49, %v656_v45  ;;  %v635_v54 = vpop.f32.mrb[14].mxu0  ;;  %v659_v55 = vpop.f32.mrb[14].mxu1 }
 0x110   :  { %v636_v56 = vpop.f32.mrb[15].mxu0  ;;  %v660_v57 = vpop.f32.mrb[15].mxu1 }
 0x111   :  { %v564_v58 = vpack.c.bf16 %v390_v50, %v389_v46  ;;  %v584_v59 = vpack.c.bf16 %v398_v51, %v397_v47  ;;  %v352_v60 = vmul.f32 %v634_v52, %v842_v35  ;;  %v360_v61 = vmul.f32 %v658_v53, %v842_v35 }
 0x112   :  { %v637_v62 = vadd.f32 %v636_v56, %v635_v54  ;;  %v661_v63 = vadd.f32 %v660_v57, %v659_v55 }
 0x113   :  { %592 = vst [vmem:[%s909_s4 + $0x10] sm:$0xff] %v564_v58   ;;  %596 = vst [vmem:[%s909_s4 + $0x30] sm:$0xff] %v584_v59   ;;  %v375_v0 = vadd.f32 %v847_v41, %v352_v60  ;;  %v383_v1 = vadd.f32 %v847_v41, %v360_v61 }
 0x114   :  { %v353_v2 = vmul.f32 %v637_v62, %v842_v35  ;;  %v361_v3 = vmul.f32 %v661_v63, %v842_v35 }
 0x115   :  { %v391_v6 = vmax.f32 %v375_v0, 0.0  ;;  %v399_v7 = vmax.f32 %v383_v1, 0.0 }
 0x116   :  { %v376_v4 = vadd.f32 %v847_v41, %v353_v2  ;;  %v384_v5 = vadd.f32 %v847_v41, %v361_v3 }
 0x118   :  { %v392_v8 = vmax.f32 %v376_v4, 0.0  ;;  %v400_v9 = vmax.f32 %v384_v5, 0.0 }
 0x11a   :  { %v569_v10 = vpack.c.bf16 %v392_v8, %v391_v6  ;;  %v589_v11 = vpack.c.bf16 %v400_v9, %v399_v7 }
 0x11c   :  { %593 = vst [vmem:[%s909_s4 + $0x18] sm:$0xff] %v569_v10   ;;  %597 = vst [vmem:[%s909_s4 + $0x38] sm:$0xff] %v589_v11  }

// kernel: forward.5
= control target key start
LH: loop header
LB: loop body
LE: loop exit
PB: predicated region body
PF: predicated region fallthrough
CT: control target
= control target key end

     0   :  { %s1502_s18 = smov 0   ;;  %s1504_s19 = smov 0   ;;  %s1756_s0 = inlined_call_operand.vmem [shape: bf16[128,128], index: 0, kind: input, shape index: {}]   ;;  %s1757_s1 = inlined_call_operand.vmem [shape: bf16[128,256], index: 1, kind: input, shape index: {}]   ;;  %s1758_s2 = inlined_call_operand.vmem [shape: f32[1,256], index: 2, kind: input, shape index: {}]   ;;  %s1759_s3 = inlined_call_operand.vmem [shape: f32[1,256], index: 3, kind: input, shape index: {}]   ;;  %s1760_s4 = inlined_call_operand.vmem [shape: bf16[128,256], index: 4, kind: input, shape index: {}]   ;;  %s1761_s5 = inlined_call_operand.vmem [shape: bf16[128,256], index: 5, kind: output, shape index: {}]  }
   0x1   :  { %s1506_s20 = smov 0   ;;  %s1508_s21 = smov 0  }
   0x2   :  { %s1510_s22 = smov 0  }
   0x3 LB: > { %s24_s23 = sadd.s32 1, %s1466_s21  ;;  %s1159_s24 = sadd.s32 4294967295, %s1470_s22   ;;  %s1470_s22 = sphi %s1510_s22, %s15_s22   ;;  %s1466_s21 = sphi %s1508_s21, %s1767_s21   ;;  %s1462_s20 = sphi %s1506_s20, %s1766_s20   ;;  %s1458_s19 = sphi %s1504_s19, %s1765_s19   ;;  %s1454_s18 = sphi %s1502_s18, %s1764_s18  }
   0x4   : > { %p25_p0 = scmp.ge.s32.totalorder %s24_s23, 2  ;;  %p67_p1 = scmp.ne.s32.totalorder %s1458_s19, %s1454_s18 }
   0x5   : > { %p68_p2 = scmp.eq.s32.totalorder %s1470_s22, 0  ;;  %p179_p4 = scmp.eq.s32.totalorder %s1159_s24, 1 }
   0x6   : > { %s1769_s23 = smov (%p25_p0, %s24_s23), 0  ;;  %s60_s27 = sadd.s32 1, %s1458_s19 }
   0x7   : > { %p1534_p3 = por %p68_p2, %p67_p1  ;;  %s57_s26 = ssub.s32 %s1466_s21, %s1769_s23 }
   0x8   : > { %p58_p5 = scmp.eq.s32.totalorder %s57_s26, 0  ;;  %p1541_p6 = por %p179_p4, %p67_p1 }
   0x9   : > { %p1163_p7 = scmp.ge.s32.totalorder %s1470_s22, 2 }
   0xa   : > { %s1546_s29 = scalar_select %p58_p5, %s1458_s19, %s60_s27  }
   0xb   : > { %210 = sbr.rel (%p1163_p7) target bundleno = 46 (0x2e), region = 20 }
  0x12   : > { %213 = sbr.rel (!%p1534_p3) target bundleno = 32 (0x20), region = 24  ;;  %s215_s30 = sand.u32 (%p1534_p3), 1, %s1458_s19  }
  0x13   : > { %s1165_s6 = sshll.u32 (%p1534_p3), %s1466_s21, 2  ;;  %s1164_s7 = sshll.u32 (%p1534_p3), %s215_s30, 6 }
  0x14   : > { %s1556_s10 = scalar_lea.vmem (%p1534_p3), %s1757_s1, %s1165_s6  ;;  %s217_s11 = scalar_lea.vmem (%p1534_p3), [#allocation2], %s1164_s7 }
  0x15   : > { %v235_v0 = vld [vmem:[%s1556_s10] sm:$0xf] (%p1534_p3)  ;;  %v237_v1 = vld [vmem:[%s1556_s10 + $0x8] sm:$0xf] (%p1534_p3)  ;;  %v239_v2 = vld [vmem:[%s1556_s10 + $0x10] sm:$0xf] (%p1534_p3) }
  0x16   : > { %236 = vst [vmem:[%s217_s11] sm:$0xf] (%p1534_p3), %v235_v0  ;;  %238 = vst [vmem:[%s217_s11 + $0x4] sm:$0xf] (%p1534_p3), %v237_v1  ;;  %v241_v3 = vld [vmem:[%s1556_s10 + $0x18] sm:$0xf] (%p1534_p3) }
  0x17   : > { %v243_v4 = vld [vmem:[%s1556_s10 + $0x20] sm:$0xf] (%p1534_p3)  ;;  %240 = vst [vmem:[%s217_s11 + $0x8] sm:$0xf] (%p1534_p3), %v239_v2  ;;  %242 = vst [vmem:[%s217_s11 + $0xc] sm:$0xf] (%p1534_p3), %v241_v3 }
  0x18   : > { %244 = vst [vmem:[%s217_s11 + $0x10] sm:$0xf] (%p1534_p3), %v243_v4  ;;  %v245_v5 = vld [vmem:[%s1556_s10 + $0x28] sm:$0xf] (%p1534_p3)  ;;  %v247_v6 = vld [vmem:[%s1556_s10 + $0x30] sm:$0xf] (%p1534_p3) }
  0x19   : > { %v249_v7 = vld [vmem:[%s1556_s10 + $0x38] sm:$0xf]  ;;  %246 = vst [vmem:[%s217_s11 + $0x14] sm:$0xf] %v245_v5  ;;  %248 = vst [vmem:[%s217_s11 + $0x18] sm:$0xf] %v247_v6 }
  0x1a   : > { %250 = vst [vmem:[%s217_s11 + $0x1c] sm:$0xf] %v249_v7  ;;  %v251_v8 = vld [vmem:[%s1556_s10 + $0x40] sm:$0xf]  ;;  %v253_v9 = vld [vmem:[%s1556_s10 + $0x48] sm:$0xf] }
  0x1b   : > { %v255_v10 = vld [vmem:[%s1556_s10 + $0x50] sm:$0xf]  ;;  %252 = vst [vmem:[%s217_s11 + $0x20] sm:$0xf] %v251_v8  ;;  %254 = vst [vmem:[%s217_s11 + $0x24] sm:$0xf] %v253_v9 }
  0x1c   : > { %256 = vst [vmem:[%s217_s11 + $0x28] sm:$0xf] %v255_v10  ;;  %v257_v11 = vld [vmem:[%s1556_s10 + $0x58] sm:$0xf]  ;;  %v259_v12 = vld [vmem:[%s1556_s10 + $0x60] sm:$0xf] }
  0x1d   : > { %v261_v13 = vld [vmem:[%s1556_s10 + $0x68] sm:$0xf]  ;;  %258 = vst [vmem:[%s217_s11 + $0x2c] sm:$0xf] %v257_v11  ;;  %260 = vst [vmem:[%s217_s11 + $0x30] sm:$0xf] %v259_v12 }
  0x1e   : > { %262 = vst [vmem:[%s217_s11 + $0x34] sm:$0xf] %v261_v13  ;;  %v263_v14 = vld [vmem:[%s1556_s10 + $0x70] sm:$0xf]  ;;  %v265_v15 = vld [vmem:[%s1556_s10 + $0x78] sm:$0xf] }
  0x1f   : > { %264 = vst [vmem:[%s217_s11 + $0x38] sm:$0xf] %v263_v14  ;;  %266 = vst [vmem:[%s217_s11 + $0x3c] sm:$0xf] %v265_v15 }
  0x20 PF: > { %333 = sbr.rel (!%p1534_p3) target bundleno = 46 (0x2e), region = 73  ;;  %s335_s12 = sand.u32 (%p1534_p3), 1, %s1458_s19  }
  0x21   : > { %s1167_s13 = sshll.u32 (%p1534_p3), %s1466_s21, 2  ;;  %s1166_s14 = sshll.u32 (%p1534_p3), %s335_s12, 6 }
  0x22   : > { %s1581_s17 = scalar_lea.vmem (%p1534_p3), %s1760_s4, %s1167_s13  ;;  %s337_s24 = scalar_lea.vmem (%p1534_p3), [#allocation3], %s1166_s14 }
  0x23   : > { %v358_v16 = vld [vmem:[%s1581_s17] sm:$0xf] (%p1534_p3)  ;;  %v360_v17 = vld [vmem:[%s1581_s17 + $0x8] sm:$0xf] (%p1534_p3)  ;;  %v362_v18 = vld [vmem:[%s1581_s17 + $0x10] sm:$0xf] (%p1534_p3) }
  0x24   : > { %359 = vst [vmem:[%s337_s24] sm:$0xf] (%p1534_p3), %v358_v16  ;;  %361 = vst [vmem:[%s337_s24 + $0x4] sm:$0xf] (%p1534_p3), %v360_v17  ;;  %v364_v19 = vld [vmem:[%s1581_s17 + $0x18] sm:$0xf] (%p1534_p3) }
  0x25   : > { %v366_v20 = vld [vmem:[%s1581_s17 + $0x20] sm:$0xf] (%p1534_p3)  ;;  %363 = vst [vmem:[%s337_s24 + $0x8] sm:$0xf] (%p1534_p3), %v362_v18  ;;  %365 = vst [vmem:[%s337_s24 + $0xc] sm:$0xf] (%p1534_p3), %v364_v19 }
  0x26   : > { %367 = vst [vmem:[%s337_s24 + $0x10] sm:$0xf] (%p1534_p3), %v366_v20  ;;  %v368_v21 = vld [vmem:[%s1581_s17 + $0x28] sm:$0xf] (%p1534_p3)  ;;  %v370_v22 = vld [vmem:[%s1581_s17 + $0x30] sm:$0xf] (%p1534_p3) }
  0x27   : > { %v372_v23 = vld [vmem:[%s1581_s17 + $0x38] sm:$0xf]  ;;  %369 = vst [vmem:[%s337_s24 + $0x14] sm:$0xf] %v368_v21  ;;  %371 = vst [vmem:[%s337_s24 + $0x18] sm:$0xf] %v370_v22 }
  0x28   : > { %373 = vst [vmem:[%s337_s24 + $0x1c] sm:$0xf] %v372_v23  ;;  %v374_v24 = vld [vmem:[%s1581_s17 + $0x40] sm:$0xf]  ;;  %v376_v25 = vld [vmem:[%s1581_s17 + $0x48] sm:$0xf] }
  0x29   : > { %v378_v26 = vld [vmem:[%s1581_s17 + $0x50] sm:$0xf]  ;;  %375 = vst [vmem:[%s337_s24 + $0x20] sm:$0xf] %v374_v24  ;;  %377 = vst [vmem:[%s337_s24 + $0x24] sm:$0xf] %v376_v25 }
  0x2a   : > { %379 = vst [vmem:[%s337_s24 + $0x28] sm:$0xf] %v378_v26  ;;  %v380_v27 = vld [vmem:[%s1581_s17 + $0x58] sm:$0xf]  ;;  %v382_v28 = vld [vmem:[%s1581_s17 + $0x60] sm:$0xf] }
  0x2b   : > { %v384_v29 = vld [vmem:[%s1581_s17 + $0x68] sm:$0xf]  ;;  %381 = vst [vmem:[%s337_s24 + $0x2c] sm:$0xf] %v380_v27  ;;  %383 = vst [vmem:[%s337_s24 + $0x30] sm:$0xf] %v382_v28 }
  0x2c   : > { %385 = vst [vmem:[%s337_s24 + $0x34] sm:$0xf] %v384_v29  ;;  %v386_v30 = vld [vmem:[%s1581_s17 + $0x70] sm:$0xf]  ;;  %v388_v31 = vld [vmem:[%s1581_s17 + $0x78] sm:$0xf] }
  0x2d   : > { %387 = vst [vmem:[%s337_s24 + $0x38] sm:$0xf] %v386_v30  ;;  %389 = vst [vmem:[%s337_s24 + $0x3c] sm:$0xf] %v388_v31 }
  0x2e PF: > { %p1168_p8 = scmp.ge.s32.totalorder %s1470_s22, 1  ;;  %p443_p9 = scmp.lt.s32.totalorder %s1470_s22, 3 }
  0x30   : > { %p444_p10 = pnand %p1168_p8, %p443_p9 }
  0x31   : > { %s450_s25 = sand.u32 (!%p444_p10), 1, %s1454_s18   ;;  %v1424_v32 = vld [vmem:[%s1756_s0] sm:$0xff] (!%p444_p10)   ;;  %v1426_v42 = vld [vmem:[%s1756_s0 + $0x8] sm:$0xff] (!%p444_p10)   ;;  %v1428_v44 = vld [vmem:[%s1756_s0 + $0x10] sm:$0xff] (!%p444_p10)   ;;  %p504_p11 = scmp.lt.s32.totalorder (!%p444_p10), %s1462_s20, 1 }
  0x32   : > { %447 = sbr.rel (%p444_p10) target bundleno = 332 (0x14c), region = 114  ;;  %s1605_s30 = sshll.u32 (!%p444_p10), %s450_s25, 6  ;;  %v1425_v33 = vld [vmem:[%s1756_s0 + $0x20] sm:$0xff] (!%p444_p10)   ;;  %1344 = vmatprep.mubr.bf16.mxu0 (!%p444_p10), %v1424_v32  ;;  %v1427_v43 = vld [vmem:[%s1756_s0 + $0x28] sm:$0xff] (!%p444_p10)   ;;  %v1429_v45 = vld [vmem:[%s1756_s0 + $0x30] sm:$0xff] (!%p444_p10)  }
  0x33   : > { %s1611_s8 = scalar_lea.vmem (!%p444_p10), [#allocation2], %s1605_s30  ;;  %1352 = vmatprep.mubr.bf16.mxu1 (!%p444_p10), %v1425_v33  ;;  %v1430_v46 = vld [vmem:[%s1756_s0 + $0x18] sm:$0xff] (!%p444_p10)   ;;  %s1689_s11 = scalar_lea.vmem (!%p444_p10), [#allocation4], %s1605_s30 }
  0x34   : > { %v1416_v34 = vld [vmem:[%s1611_s8] sm:$0xff] (!%p444_p10)   ;;  %v1417_v35 = vld [vmem:[%s1611_s8 + $0x8] sm:$0xff] (!%p444_p10)   ;;  %v1418_v36 = vld [vmem:[%s1611_s8 + $0x10] sm:$0xff] (!%p444_p10)  }
  0x35   : > { %1328 = vmatprep.subr.bf16.mxu0 (!%p444_p10), %v1416_v34  ;;  %1360 = vmatprep.subr.bf16.mxu1 (!%p444_p10), %v1416_v34  ;;  %v1419_v37 = vld [vmem:[%s1611_s8 + $0x18] sm:$0xff] (!%p444_p10)   ;;  %v1420_v38 = vld [vmem:[%s1611_s8 + $0x20] sm:$0xff] (!%p444_p10)   ;;  %v1421_v39 = vld [vmem:[%s1611_s8 + $0x28] sm:$0xff] (!%p444_p10)  }
  0x36   : > { %1329 = vmatpush3.bf16.msra.mxu0 (!%p444_p10), %v1416_v34  ;;  %1368 = vmatpush3.bf16.msra.mxu1 (!%p444_p10), %v1416_v34  ;;  %v1422_v40 = vld [vmem:[%s1611_s8 + $0x30] sm:$0xff] (!%p444_p10)   ;;  %v1423_v41 = vld [vmem:[%s1611_s8 + $0x38] sm:$0xff] (!%p444_p10)   ;;  %s459_s8 = scalar_lea.vmem (!%p444_p10), [#allocation3], %s1605_s30 }
  0x37   : > { %1330 = vmatprep.subr.bf16.mxu0 (!%p444_p10), %v1417_v35  ;;  %1361 = vmatprep.subr.bf16.mxu1 (!%p444_p10), %v1417_v35  ;;  %v1431_v47 = vld [vmem:[%s1756_s0 + $0x38] sm:$0xff] (!%p444_p10)   ;;  %v1298_v48 = vld [vmem:[%s459_s8 + $0x8] sm:$0xff] (!%p444_p10)   ;;  %v1227_v50 = vld [vmem:[%s459_s8] sm:$0xff] (!%p444_p10)  }
  0x38   : > { %v1302_v49 = vld [vmem:[%s459_s8 + $0x28] sm:$0xff] (!%p444_p10)   ;;  %v1301_v51 = vld [vmem:[%s459_s8 + $0x20] sm:$0xff] (!%p444_p10)   ;;  %v1650_v53 = vld [vmem:[%s459_s8 + $0x18] sm:$0xff] (!%p444_p10)   ;;  %v1232_v55 = vunpack.c.l.bf16 (!%p444_p10), %v1298_v48  ;;  %v1228_v57 = vunpack.c.l.bf16 (!%p444_p10), %v1227_v50  ;;  %v1233_v0 = vunpack.c.h.bf16 (!%p444_p10), %v1298_v48  ;;  %v1229_v2 = vunpack.c.h.bf16 (!%p444_p10), %v1227_v50 }
  0x39   : > { %s505_s26 = scalar_select %p504_p11, %s1462_s20, 1  ;;  %v1652_v54 = vld [vmem:[%s459_s8 + $0x38] sm:$0xff]   ;;  %v1248_v56 = vunpack.c.l.bf16 %v1302_v49  ;;  %v1244_v58 = vunpack.c.l.bf16 %v1301_v51  ;;  %v1654_v59 = vld [vmem:[%s459_s8 + $0x10] sm:$0xff]   ;;  %v1249_v1 = vunpack.c.h.bf16 %v1302_v49  ;;  %v1245_v3 = vunpack.c.h.bf16 %v1301_v51 }
  0x3a   : > { %1331 = vmatpush3.bf16.msra.mxu0 %v1417_v35  ;;  %1369 = vmatpush3.bf16.msra.mxu1 %v1417_v35  ;;  %v1656_v60 = vld [vmem:[%s459_s8 + $0x30] sm:$0xff]   ;;  %v1240_v8 = vunpack.c.l.bf16 %v1650_v53  ;;  %v1256_v9 = vunpack.c.l.bf16 %v1652_v54  ;;  %v1236_v14 = vunpack.c.l.bf16 %v1654_v59  ;;  %s1207_s30 = sshll.u32 (%p1541_p6), %s1462_s20, 2 }
  0x3b   : > { %1332 = vmatprep.subr.bf16.mxu0 %v1418_v36  ;;  %1362 = vmatprep.subr.bf16.mxu1 %v1418_v36  ;;  %s506_s7 = scalar_lea.vmem %s1758_s2, %s505_s26  ;;  %s509_s10 = scalar_lea.vmem %s1759_s3, %s505_s26  ;;  %v1252_v15 = vunpack.c.l.bf16 %v1656_v60 }
  0x3c   : > { %v1648_v52 = vld [vmem:[%s506_s7] ss:$0 sm:$0xff]  ;;  %s939_s14 = scalar_lea.vmem (%p1541_p6), %s1761_s5, %s1207_s30 }
  0x3d   : > { %v1658_v62 = vld [vmem:[%s509_s10] ss:$0 sm:$0xff] }
  0x3e   : > { %1333 = vmatpush3.bf16.msra.mxu0 %v1418_v36  ;;  %1370 = vmatpush3.bf16.msra.mxu1 %v1418_v36 }
  0x3f   : > { %1334 = vmatprep.subr.bf16.mxu0 %v1419_v37  ;;  %1363 = vmatprep.subr.bf16.mxu1 %v1419_v37 }
  0x42   : > { %1335 = vmatpush3.bf16.msra.mxu0 %v1419_v37  ;;  %1371 = vmatpush3.bf16.msra.mxu1 %v1419_v37 }
  0x43   : > { %1336 = vmatprep.subr.bf16.mxu0 %v1420_v38  ;;  %1364 = vmatprep.subr.bf16.mxu1 %v1420_v38 }
  0x46   : > { %1337 = vmatpush3.bf16.msra.mxu0 %v1420_v38  ;;  %1372 = vmatpush3.bf16.msra.mxu1 %v1420_v38 }
  0x47   : > { %1338 = vmatprep.subr.bf16.mxu0 %v1421_v39  ;;  %1365 = vmatprep.subr.bf16.mxu1 %v1421_v39 }
  0x4a   : > { %1339 = vmatpush3.bf16.msra.mxu0 %v1421_v39  ;;  %1373 = vmatpush3.bf16.msra.mxu1 %v1421_v39 }
  0x4b   : > { %1340 = vmatprep.subr.bf16.mxu0 %v1422_v40  ;;  %1366 = vmatprep.subr.bf16.mxu1 %v1422_v40 }
  0x4e   : > { %1341 = vmatpush3.bf16.msra.mxu0 %v1422_v40  ;;  %1374 = vmatpush3.bf16.msra.mxu1 %v1422_v40 }
  0x4f   : > { %1342 = vmatprep.subr.bf16.mxu0 %v1423_v41  ;;  %1367 = vmatprep.subr.bf16.mxu1 %v1423_v41 }
  0x52   : > { %1343 = vmatpush3.bf16.msra.mxu0 %v1423_v41  ;;  %1375 = vmatpush3.bf16.msra.mxu1 %v1423_v41 }
  0x55   : > { %1345 = vmatmul.mubr.bf16.vlgmr.msra.gmra.mrb[0].mxu0 %v1426_v42  ;;  %1353 = vmatmul.mubr.bf16.vlgmr.msra.gmra.mrb[0].mxu1 %v1427_v43 }
  0x56   : > { %1348 = vmatprep.mubr.bf16.mxu0 %v1428_v44  ;;  %1356 = vmatprep.mubr.bf16.mxu1 %v1429_v45 }
  0x5d   : > { %1349 = vmatmul.mubr.bf16.gmra.mrb[4].mxu0 %v1430_v46  ;;  %1357 = vmatmul.mubr.bf16.gmra.mrb[4].mxu1 %v1431_v47 }
 0x128   : > { %v1346_v61 = vpop.f32.mrb[0].mxu0  ;;  %v1354_v63 = vpop.f32.mrb[0].mxu1 }
 0x129   : > { %v747_v4 = vmul.f32 %v1346_v61, %v1648_v52  ;;  %v755_v5 = vmul.f32 %v1354_v63, %v1648_v52  ;;  %v675_v6 = vpop.f32.mrb[1].mxu0  ;;  %v707_v7 = vpop.f32.mrb[1].mxu1 }
 0x12a   : > { %v745_v10 = vmul.f32 %v1648_v52, %v675_v6  ;;  %v753_v11 = vmul.f32 %v1648_v52, %v707_v7  ;;  %v1347_v12 = vpop.f32.mrb[2].mxu0  ;;  %v1355_v13 = vpop.f32.mrb[2].mxu1 }
 0x12b   : > { %v770_v16 = vadd.f32 %v1658_v62, %v747_v4  ;;  %v778_v17 = vadd.f32 %v1658_v62, %v755_v5  ;;  %v748_v18 = vmul.f32 %v1347_v12, %v1648_v52  ;;  %v756_v19 = vmul.f32 %v1355_v13, %v1648_v52  ;;  %v678_v20 = vpop.f32.mrb[3].mxu0  ;;  %v710_v21 = vpop.f32.mrb[3].mxu1 }
 0x12c   : > { %v768_v22 = vadd.f32 %v1658_v62, %v745_v10  ;;  %v776_v23 = vadd.f32 %v1658_v62, %v753_v11  ;;  %v746_v24 = vmul.f32 %v1648_v52, %v678_v20  ;;  %v754_v25 = vmul.f32 %v1648_v52, %v710_v21 }
 0x12d   : > { %v818_v26 = vadd.f32 %v1232_v55, %v770_v16  ;;  %v826_v27 = vadd.f32 %v1248_v56, %v778_v17  ;;  %v771_v28 = vadd.f32 %v1658_v62, %v748_v18  ;;  %v779_v29 = vadd.f32 %v1658_v62, %v756_v19 }
 0x12e   : > { %v816_v30 = vadd.f32 %v1228_v57, %v768_v22  ;;  %v824_v31 = vadd.f32 %v1244_v58, %v776_v23  ;;  %v769_v32 = vadd.f32 %v1658_v62, %v746_v24  ;;  %v777_v33 = vadd.f32 %v1658_v62, %v754_v25 }
 0x12f   : > { %v834_v34 = vmax.f32 %v818_v26, 0.0  ;;  %v842_v35 = vmax.f32 %v826_v27, 0.0  ;;  %v819_v36 = vadd.f32 %v1233_v0, %v771_v28  ;;  %v827_v37 = vadd.f32 %v1249_v1, %v779_v29 }
 0x130   : > { %v832_v38 = vmax.f32 %v816_v30, 0.0  ;;  %v840_v39 = vmax.f32 %v824_v31, 0.0  ;;  %v817_v40 = vadd.f32 %v1229_v2, %v769_v32  ;;  %v825_v41 = vadd.f32 %v1245_v3, %v777_v33  ;;  %v1350_v42 = vpop.f32.mrb[4].mxu0  ;;  %v1358_v43 = vpop.f32.mrb[4].mxu1 }
 0x131   : > { %v835_v44 = vmax.f32 %v819_v36, 0.0  ;;  %v843_v45 = vmax.f32 %v827_v37, 0.0  ;;  %v751_v46 = vmul.f32 %v1350_v42, %v1648_v52  ;;  %v759_v47 = vmul.f32 %v1358_v43, %v1648_v52  ;;  %v691_v48 = vpop.f32.mrb[5].mxu0  ;;  %v723_v49 = vpop.f32.mrb[5].mxu1 }
 0x132   : > { %v833_v50 = vmax.f32 %v817_v40, 0.0  ;;  %v841_v51 = vmax.f32 %v825_v41, 0.0  ;;  %v749_v55 = vmul.f32 %v1648_v52, %v691_v48  ;;  %v757_v56 = vmul.f32 %v1648_v52, %v723_v49  ;;  %v1351_v57 = vpop.f32.mrb[6].mxu0  ;;  %v1359_v58 = vpop.f32.mrb[6].mxu1 }
 0x133   : > { %v1266_v61 = vpack.c.bf16 %v835_v44, %v834_v34  ;;  %v1286_v63 = vpack.c.bf16 %v843_v45, %v842_v35  ;;  %v774_v0 = vadd.f32 %v1658_v62, %v751_v46  ;;  %v782_v1 = vadd.f32 %v1658_v62, %v759_v47  ;;  %v694_v2 = vpop.f32.mrb[7].mxu0  ;;  %v726_v3 = vpop.f32.mrb[7].mxu1 }
 0x134   : > { %v1261_v4 = vpack.c.bf16 %v833_v50, %v832_v38  ;;  %v1281_v5 = vpack.c.bf16 %v841_v51, %v840_v39  ;;  %v772_v6 = vadd.f32 %v1658_v62, %v749_v55  ;;  %v780_v7 = vadd.f32 %v1658_v62, %v757_v56 }
 0x135   : > { %1305 = vst [vmem:[%s1689_s11 + $0x8] sm:$0xff] %v1266_v61   ;;  %1309 = vst [vmem:[%s1689_s11 + $0x28] sm:$0xff] %v1286_v63   ;;  %v752_v10 = vmul.f32 %v1351_v57, %v1648_v52  ;;  %v1241_v11 = vunpack.c.h.bf16 %v1650_v53  ;;  %v760_v12 = vmul.f32 %v1359_v58, %v1648_v52  ;;  %v1257_v13 = vunpack.c.h.bf16 %v1652_v54 }
 0x136   : > { %1262 = vst [vmem:[%s1689_s11] sm:$0xff] %v1261_v4   ;;  %1308 = vst [vmem:[%s1689_s11 + $0x20] sm:$0xff] %v1281_v5   ;;  %v750_v16 = vmul.f32 %v1648_v52, %v694_v2  ;;  %v1237_v17 = vunpack.c.h.bf16 %v1654_v59  ;;  %v758_v18 = vmul.f32 %v1648_v52, %v726_v3  ;;  %v1253_v19 = vunpack.c.h.bf16 %v1656_v60 }
 0x137   : > { %v822_v20 = vadd.f32 %v1240_v8, %v774_v0  ;;  %v830_v21 = vadd.f32 %v1256_v9, %v782_v1  ;;  %v775_v22 = vadd.f32 %v1658_v62, %v752_v10  ;;  %v783_v23 = vadd.f32 %v1658_v62, %v760_v12 }
 0x138   : > { %v820_v24 = vadd.f32 %v1236_v14, %v772_v6  ;;  %v828_v25 = vadd.f32 %v1252_v15, %v780_v7  ;;  %v773_v52 = vadd.f32 %v1658_v62, %v750_v16  ;;  %v781_v26 = vadd.f32 %v1658_v62, %v758_v18 }
 0x139   : > { %v823_v27 = vadd.f32 %v1241_v11, %v775_v22  ;;  %v831_v53 = vadd.f32 %v1257_v13, %v783_v23  ;;  %v838_v9 = vmax.f32 %v822_v20, 0.0  ;;  %v846_v28 = vmax.f32 %v830_v21, 0.0 }
 0x13a   : > { %v821_v54 = vadd.f32 %v1237_v17, %v773_v52  ;;  %v829_v8 = vadd.f32 %v1253_v19, %v781_v26  ;;  %v836_v14 = vmax.f32 %v820_v24, 0.0  ;;  %v844_v30 = vmax.f32 %v828_v25, 0.0  ;;  %934 = sbr.rel (!%p1541_p6) target bundleno = 332 (0x14c), region = 126 }
 0x13b   : > { %v839_v29 = vmax.f32 %v823_v27, 0.0  ;;  %v847_v59 = vmax.f32 %v831_v53, 0.0 }
 0x13c   : > { %v837_v60 = vmax.f32 %v821_v54, 0.0  ;;  %v845_v15 = vmax.f32 %v829_v8, 0.0  ;;  %v959_v36 = vld [vmem:[%s1689_s11 + $0x8] sm:$0xf] (%p1541_p6)  ;;  %v961_v37 = vld [vmem:[%s1689_s11 + $0xc] sm:$0xf] (%p1541_p6) }
 0x13d   : > { %v1276_v31 = vpack.c.bf16 %v839_v29, %v838_v9  ;;  %v1296_v32 = vpack.c.bf16 %v847_v59, %v846_v28  ;;  %v955_v34 = vld [vmem:[%s1689_s11] sm:$0xf] (%p1541_p6)  ;;  %v957_v35 = vld [vmem:[%s1689_s11 + $0x4] sm:$0xf] (%p1541_p6)  ;;  %960 = vst [vmem:[%s939_s14 + $0x10] sm:$0xf] (%p1541_p6), %v959_v36 }
 0x13e   : > { %v1271_v33 = vpack.c.bf16 %v837_v60, %v836_v14  ;;  %v1291_v62 = vpack.c.bf16 %v845_v15, %v844_v30  ;;  %956 = vst [vmem:[%s939_s14] sm:$0xf] (%p1541_p6), %v955_v34  ;;  %958 = vst [vmem:[%s939_s14 + $0x8] sm:$0xf] (%p1541_p6), %v957_v35  ;;  %v971_v42 = vld [vmem:[%s1689_s11 + $0x20] sm:$0xf] (%p1541_p6) }
 0x13f   : > { %1307 = vst [vmem:[%s1689_s11 + $0x18] sm:$0xff] %v1276_v31   ;;  %1311 = vst [vmem:[%s1689_s11 + $0x38] sm:$0xff] %v1296_v32   ;;  %v973_v43 = vld [vmem:[%s1689_s11 + $0x24] sm:$0xf] (%p1541_p6)  ;;  %v975_v44 = vld [vmem:[%s1689_s11 + $0x28] sm:$0xf] (%p1541_p6) }
 0x140   : > { %1306 = vst [vmem:[%s1689_s11 + $0x10] sm:$0xff] %v1271_v33   ;;  %1310 = vst [vmem:[%s1689_s11 + $0x30] sm:$0xff] %v1291_v62   ;;  %v977_v45 = vld [vmem:[%s1689_s11 + $0x2c] sm:$0xf] (%p1541_p6) }
 0x141   : > { %962 = vst [vmem:[%s939_s14 + $0x18] sm:$0xf] %v961_v37  ;;  %972 = vst [vmem:[%s939_s14 + $0x40] sm:$0xf] %v971_v42 }
 0x142   : > { %974 = vst [vmem:[%s939_s14 + $0x48] sm:$0xf] %v973_v43  ;;  %976 = vst [vmem:[%s939_s14 + $0x50] sm:$0xf] %v975_v44 }
 0x143   : > { %978 = vst [vmem:[%s939_s14 + $0x58] sm:$0xf] %v977_v45 }
 0x146   : > { %v967_v40 = vld [vmem:[%s1689_s11 + $0x18] sm:$0xf]  ;;  %v969_v41 = vld [vmem:[%s1689_s11 + $0x1c] sm:$0xf] }
 0x147   : > { %v963_v38 = vld [vmem:[%s1689_s11 + $0x10] sm:$0xf]  ;;  %v965_v39 = vld [vmem:[%s1689_s11 + $0x14] sm:$0xf]  ;;  %968 = vst [vmem:[%s939_s14 + $0x30] sm:$0xf] %v967_v40 }
 0x148   : > { %964 = vst [vmem:[%s939_s14 + $0x20] sm:$0xf] %v963_v38  ;;  %966 = vst [vmem:[%s939_s14 + $0x28] sm:$0xf] %v965_v39  ;;  %v979_v46 = vld [vmem:[%s1689_s11 + $0x30] sm:$0xf] }
 0x149   : > { %970 = vst [vmem:[%s939_s14 + $0x38] sm:$0xf] %v969_v41  ;;  %v981_v47 = vld [vmem:[%s1689_s11 + $0x34] sm:$0xf]  ;;  %980 = vst [vmem:[%s939_s14 + $0x60] sm:$0xf] %v979_v46 }
 0x14a   : > { %982 = vst [vmem:[%s939_s14 + $0x68] sm:$0xf] %v981_v47  ;;  %v983_v48 = vld [vmem:[%s1689_s11 + $0x38] sm:$0xf]  ;;  %v985_v49 = vld [vmem:[%s1689_s11 + $0x3c] sm:$0xf] }
 0x14b   : > { %984 = vst [vmem:[%s939_s14 + $0x70] sm:$0xf] %v983_v48  ;;  %986 = vst [vmem:[%s939_s14 + $0x78] sm:$0xf] %v985_v49 }
 0x14c PF: > { %s15_s22 = sadd.s32 1, %s1470_s22   ;;  %s1764_s18 = smov %s1458_s19 }
 0x14d   : > { %p12_p12 = scmp.ge.s32.totalorder %s15_s22, 4   ;;  %s1765_s19 = smov %s1546_s29 }
 0x14e   : > { %s1766_s20 = smov %s1466_s21  ;;  %s1767_s21 = smov %s1769_s23 }
 0x14f   :  { %14 = sbr.rel (!%p12_p12) target bundleno = 3 (0x3), region = 215 }

// kernel: forward.4
= control target key start
LH: loop header
LB: loop body
LE: loop exit
PB: predicated region body
PF: predicated region fallthrough
CT: control target
= control target key end

     0   :  { %vm222_vm0 = vsmask.f32 7424  ;;  %vm1419_vm1 = vsmask.f32 2304  ;;  %vm1762_vm2 = vcmask 1041408   ;;  %vm2069_vm4 = vcmask 1045504   ;;  %s5633_s2 = inlined_call_operand.vmem [shape: bf16[1152,128], index: 2, kind: input, shape index: {}]   ;;  %s5634_s0 = inlined_call_operand.vmem [shape: bf16[512,128], index: 0, kind: input, shape index: {}, may-alias: {0,1}]   ;;  %s5635_s1 = inlined_call_operand.vmem [shape: bf16[512,128], index: 1, kind: input, shape index: {}, may-alias: {0,1}]   ;;  %s5636_s3 = inlined_call_operand.vmem [shape: f32[1,128], index: 3, kind: input, shape index: {}]   ;;  %s5637_s4 = inlined_call_operand.vmem [shape: f32[1,128], index: 4, kind: input, shape index: {}]   ;;  %s5638_s5 = inlined_call_operand.vmem [shape: bf16[256,128], index: 5, kind: output, shape index: {}]  }
   0x1   :  { %v4468_v0 = vld [vmem:[%s5633_s2 + $0x40] sm:$0xff]   ;;  %v4470_v2 = vld [vmem:[%s5633_s2 + $0x48] sm:$0xff]   ;;  %v4472_v4 = vld [vmem:[%s5633_s2 + $0x50] sm:$0xff]   ;;  %vm2376_vm3 = vsmask.f32 5376  ;;  %vm805_vm5 = vcmask 1046528  }
   0x2   :  { %v4469_v1 = vld [vmem:[%s5633_s2 + $0x100] sm:$0xff]   ;;  %3764 = vmatprep.subr.bf16.mxu1 %v4468_v0  ;;  %v4471_v3 = vld [vmem:[%s5633_s2 + $0x108] sm:$0xff]   ;;  %v4473_v5 = vld [vmem:[%s5633_s2 + $0x110] sm:$0xff]   ;;  %vm1112_vm6 = vcmask 1042432   ;;  %vm2722_vm7 = vcmask 1044480  }
   0x3   :  { %3956 = vmatprep.subr.bf16.mxu0 %v4469_v1  ;;  %3765 = vmatpush3.bf16.msra.mxu1 %v4468_v0  ;;  %v4474_v6 = vld [vmem:[%s5633_s2 + $0x58] sm:$0xff]   ;;  %v4476_v8 = vld [vmem:[%s5633_s2 + $0x60] sm:$0xff]   ;;  %v4478_v10 = vld [vmem:[%s5633_s2 + $0x68] sm:$0xff]  }
   0x4   :  { %3957 = vmatpush3.bf16.msra.mxu0 %v4469_v1  ;;  %3766 = vmatprep.subr.bf16.mxu1 %v4470_v2  ;;  %v4475_v7 = vld [vmem:[%s5633_s2 + $0x118] sm:$0xff]   ;;  %v4477_v9 = vld [vmem:[%s5633_s2 + $0x120] sm:$0xff]   ;;  %v4479_v11 = vld [vmem:[%s5633_s2 + $0x128] sm:$0xff]  }
   0x5   :  { %3958 = vmatprep.subr.bf16.mxu0 %v4471_v3  ;;  %v4652_v12 = vld [vmem:[%s5634_s0] sm:$0xff]   ;;  %v4657_v13 = vld [vmem:[%s5634_s0 + $0x8] sm:$0xff]   ;;  %v4662_v14 = vld [vmem:[%s5634_s0 + $0x10] sm:$0xff]  }
   0x6   :  { %v224_v15 = vshrl.u32 %v4652_v12, 16  ;;  %v226_v16 = vshll.u32 %v4652_v12, 16  ;;  %v4667_v17 = vshll.u32 %v4657_v13, 16  ;;  %v4670_v18 = vshrl.u32 %v4657_v13, 16  ;;  %v4480_v19 = vld [vmem:[%s5633_s2 + $0x70] sm:$0xff]   ;;  %v4482_v27 = vld [vmem:[%s5633_s2 + $0x78] sm:$0xff]  }
   0x7   :  { %3767 = vmatpush3.bf16.msra.mxu1 %v4470_v2  ;;  %v4481_v20 = vld [vmem:[%s5633_s2 + $0x130] sm:$0xff]   ;;  %v4679_v21 = vshll.u32 %v4662_v14, 16  ;;  %v4682_v22 = vshrl.u32 %v4662_v14, 16  ;;  %v4483_v30 = vld [vmem:[%s5633_s2 + $0x138] sm:$0xff]   ;;  %v4704_v38 = vld [vmem:[%s5634_s0 + $0x20] sm:$0xff]  }
   0x8   :  { %3959 = vmatpush3.bf16.msra.mxu0 %v4471_v3  ;;  %3768 = vmatprep.subr.bf16.mxu1 %v4472_v4  ;;  %v228_v23 = vrot.slane %v226_v16, 1  ;;  %v233_v24 = vrot.slane %v4667_v17, 1  ;;  %v1420_v25 = vrot.slane %v224_v15, 5  ;;  %v1421_v26 = vrot.slane %v226_v16, 6  ;;  %v4698_v36 = vld [vmem:[%s5634_s0 + $0x18] sm:$0xff]   ;;  %v4487_v45 = vld [vmem:[%s5633_s2] sm:$0xff]  }
   0x9   :  { %3960 = vmatprep.subr.bf16.mxu0 %v4473_v5  ;;  %v1423_v28 = vrot.slane %v4670_v18, 5  ;;  %v1424_v29 = vrot.slane %v4667_v17, 6  ;;  %v1427_v33 = vrot.slane %v4682_v22, 5  ;;  %v1428_v35 = vrot.slane %v4679_v21, 6  ;;  %v4488_v50 = vld [vmem:[%s5633_s2 + $0x140] sm:$0xff]   ;;  %v4735_v54 = vld [vmem:[%s5634_s0 + $0x28] sm:$0xff]  }
   0xa   :  { %v229_v31 = vor.u32 %v228_v23, %v224_v15  ;;  %v1422_v32 = vor.u32 %v1421_v26, %v1420_v25  ;;  %v4708_v40 = vshll.u32 %v4698_v36, 16  ;;  %v4711_v41 = vshrl.u32 %v4698_v36, 16  ;;  %v4749_v61 = vld [vmem:[%s5634_s0 + $0x30] sm:$0xff]   ;;  %v4489_v62 = vld [vmem:[%s5633_s2 + $0x148] sm:$0xff]   ;;  %v4777_v15 = vld [vmem:[%s5634_s0 + $0x38] sm:$0xff]  }
   0xb   :  { %3769 = vmatpush3.bf16.msra.mxu1 %v4472_v4  ;;  %v1425_v34 = vor.u32 %v1424_v29, %v1423_v28  ;;  %v237_v42 = vor.u32 %v4670_v18, %v233_v24  ;;  %v241_v43 = vrot.slane %v4679_v21, 1  ;;  %v4716_v44 = vshrl.u32 %v4704_v38, 16  ;;  %v4492_v4 = vld [vmem:[%s5633_s2 + $0x8] sm:$0xff]   ;;  %v4493_v16 = vld [vmem:[%s5633_s2 + $0x150] sm:$0xff]  }
   0xc   :  { %3961 = vmatpush3.bf16.msra.mxu0 %v4473_v5  ;;  %3770 = vmatprep.subr.bf16.mxu1 %v4474_v6  ;;  %v234_v37 = vsel %vm222_vm0, %v229_v31, %v233_v24  ;;  %v1429_v46 = vor.u32 %v1428_v35, %v1427_v33  ;;  %v1431_v47 = vrot.slane %v4711_v41, 5  ;;  %v1432_v48 = vrot.slane %v4708_v40, 6  ;;  %v4502_v35 = vld [vmem:[%s5633_s2 + $0x18] sm:$0xff]  }
   0xd   :  { %3962 = vmatprep.subr.bf16.mxu0 %v4475_v7  ;;  %3780 = vmatprep.mubr.bf16.mxu1 %v234_v37  ;;  %v1426_v39 = vsel %vm1419_vm1, %v1422_v32, %v1425_v34  ;;  %v4724_v49 = vshll.u32 %v4704_v38, 16  ;;  %v245_v51 = vor.u32 %v4682_v22, %v241_v43  ;;  %v249_v52 = vrot.slane %v4708_v40, 1 }
   0xe   :  { %3972 = vmatprep.mubr.bf16.mxu0 %v1426_v39  ;;  %v1435_v53 = vrot.slane %v4716_v44, 5  ;;  %v1433_v55 = vor.u32 %v1432_v48, %v1431_v47  ;;  %v242_v56 = vsel %vm222_vm0, %v237_v42, %v241_v43  ;;  %v4739_v57 = vshll.u32 %v4735_v54, 16  ;;  %v4820_v47 = vld [vmem:[%s5634_s0 + $0x48] sm:$0xff]   ;;  %v4498_v48 = vld [vmem:[%s5633_s2 + $0x160] sm:$0xff]  }
   0xf   :  { %3771 = vmatpush3.bf16.msra.mxu1 %v4474_v6  ;;  %v4742_v58 = vshrl.u32 %v4735_v54, 16  ;;  %v1430_v59 = vsel %vm1419_vm1, %v1425_v34, %v1429_v46  ;;  %v1436_v60 = vrot.slane %v4724_v49, 6  ;;  %v250_v63 = vsel %vm222_vm0, %v245_v51, %v249_v52  ;;  %v4507_v51 = vld [vmem:[%s5633_s2 + $0x20] sm:$0xff]  }
  0x10   :  { %3963 = vmatpush3.bf16.msra.mxu0 %v4475_v7  ;;  %3772 = vmatprep.subr.bf16.mxu1 %v4476_v8  ;;  %v1440_v1 = vrot.slane %v4739_v57, 6  ;;  %v1434_v2 = vsel %vm1419_vm1, %v1429_v46, %v1433_v55  ;;  %v257_v3 = vrot.slane %v4724_v49, 1  ;;  %v4763_v5 = vshll.u32 %v4749_v61, 16 }
  0x11   :  { %3964 = vmatprep.subr.bf16.mxu0 %v4477_v9  ;;  %v1439_v0 = vrot.slane %v4742_v58, 5  ;;  %v4766_v6 = vshrl.u32 %v4749_v61, 16  ;;  %v253_v7 = vor.u32 %v4711_v41, %v249_v52  ;;  %v4789_v26 = vshrl.u32 %v4777_v15, 16 }
  0x12   :  { %v1444_v25 = vrot.slane %v4763_v5, 6  ;;  %v273_v34 = vrot.slane %v4763_v5, 1 }
  0x13   :  { %3773 = vmatpush3.bf16.msra.mxu1 %v4476_v8  ;;  %v1437_v8 = vor.u32 %v1436_v60, %v1435_v53  ;;  %v258_v23 = vsel %vm222_vm0, %v253_v7, %v257_v3  ;;  %v1443_v24 = vrot.slane %v4766_v6, 5  ;;  %v1447_v32 = vrot.slane %v4789_v26, 5 }
  0x14   :  { %3965 = vmatpush3.bf16.msra.mxu0 %v4477_v9  ;;  %3774 = vmatprep.subr.bf16.mxu1 %v4478_v10  ;;  %v261_v9 = vor.u32 %v4716_v44, %v257_v3 }
  0x15   :  { %3966 = vmatprep.subr.bf16.mxu0 %v4479_v11  ;;  %v1438_v28 = vsel %vm1419_vm1, %v1433_v55, %v1437_v8  ;;  %v1445_v39 = vor.u32 %v1444_v25, %v1443_v24  ;;  %v4499_v55 = vld [vmem:[%s5633_s2 + $0x168] sm:$0xff]   ;;  %v4872_v25 = vshrl.u32 %v4820_v47, 16 }
  0x17   :  { %3775 = vmatpush3.bf16.msra.mxu1 %v4478_v10  ;;  %v265_v10 = vrot.slane %v4739_v57, 1 }
  0x18   :  { %3967 = vmatpush3.bf16.msra.mxu0 %v4479_v11  ;;  %3776 = vmatprep.subr.bf16.mxu1 %v4480_v19  ;;  %v4497_v11 = vld [vmem:[%s5633_s2 + $0x10] sm:$0xff]  }
  0x19   :  { %3968 = vmatprep.subr.bf16.mxu0 %v4481_v20  ;;  %v266_v29 = vsel %vm222_vm0, %v261_v9, %v265_v10  ;;  %v269_v37 = vor.u32 %v4742_v58, %v265_v10  ;;  %v4858_v10 = vld [vmem:[%s5634_s0 + $0x58] sm:$0xff]  }
  0x1b   :  { %3777 = vmatpush3.bf16.msra.mxu1 %v4480_v19  ;;  %v1441_v19 = vor.u32 %v1440_v1, %v1439_v0  ;;  %v274_v52 = vsel %vm222_vm0, %v269_v37, %v273_v34  ;;  %v4843_v0 = vld [vmem:[%s5634_s0 + $0x50] sm:$0xff]   ;;  %v4519_v37 = vld [vmem:[%s5633_s2 + $0x38] sm:$0xff]  }
  0x1c   :  { %3969 = vmatpush3.bf16.msra.mxu0 %v4481_v20  ;;  %3778 = vmatprep.subr.bf16.mxu1 %v4482_v27  ;;  %v4783_v20 = vshll.u32 %v4777_v15, 16 }
  0x1d   :  { %3970 = vmatprep.subr.bf16.mxu0 %v4483_v30  ;;  %v1442_v31 = vsel %vm1419_vm1, %v1437_v8, %v1441_v19  ;;  %v1446_v53 = vsel %vm1419_vm1, %v1441_v19, %v1445_v39  ;;  %v4865_v19 = vshll.u32 %v4843_v0, 16 }
  0x1e   :  { %v1448_v33 = vrot.slane %v4783_v20, 6  ;;  %v281_v46 = vrot.slane %v4783_v20, 1 }
  0x1f   :  { %3779 = vmatpush3.bf16.msra.mxu1 %v4482_v27  ;;  %v4794_v27 = vld [vmem:[%s5634_s0 + $0x40] sm:$0xff]  }
  0x20   :  { %3971 = vmatpush3.bf16.msra.mxu0 %v4483_v30  ;;  %3812 = vmatprep.subr.bf16.mxu1 %v4487_v45  ;;  %v4494_v30 = vld [vmem:[%s5633_s2 + $0x158] sm:$0xff]   ;;  %v4810_v42 = vshll.u32 %v4794_v27, 16  ;;  %v4813_v43 = vshrl.u32 %v4794_v27, 16  ;;  %v285_v3 = vor.u32 %v4789_v26, %v281_v46 }
  0x21   :  { %4004 = vmatprep.subr.bf16.mxu0 %v4488_v50 }
  0x22   :  { %3781 = vmatmul.mubr.bf16.vlgmr.msra.gmra.mrb[0].mxu1 %v242_v56  ;;  %v1452_v60 = vrot.slane %v4810_v42, 6  ;;  %v289_v1 = vrot.slane %v4810_v42, 1 }
  0x23   :  { %3973 = vmatmul.mubr.bf16.vlgmr.msra.gmra.mrb[0].mxu0 %v1430_v59  ;;  %3813 = vmatpush3.bf16.msra.mxu1 %v4487_v45  ;;  %v277_v45 = vor.u32 %v4766_v6, %v273_v34  ;;  %v1451_v59 = vrot.slane %v4813_v43, 5  ;;  %v4890_v34 = vld [vmem:[%s5634_s0 + $0x60] sm:$0xff]  }
  0x24   :  { %4005 = vmatpush3.bf16.msra.mxu0 %v4488_v50  ;;  %3784 = vmatprep.mubr.bf16.mxu1 %v250_v63  ;;  %v1449_v50 = vor.u32 %v1448_v33, %v1447_v32  ;;  %v293_v8 = vor.u32 %v4813_v43, %v289_v1  ;;  %v290_v24 = vsel %vm222_vm0, %v285_v3, %v289_v1  ;;  %v4504_v32 = vld [vmem:[%s5633_s2 + $0x178] sm:$0xff]   ;;  %v4924_v1 = vshrl.u32 %v4890_v34, 16 }
  0x25   :  { %4006 = vmatprep.subr.bf16.mxu0 %v4489_v62  ;;  %3976 = vmatprep.mubr.bf16.mxu0 %v1434_v2  ;;  %v282_v56 = vsel %vm222_vm0, %v277_v45, %v281_v46  ;;  %v4511_v2 = vld [vmem:[%s5633_s2 + $0x28] sm:$0xff]   ;;  %v4851_v7 = vor.u32 %v1452_v60, %v1451_v59  ;;  %v1766_v45 = vrot.slane %v4662_v14, 6  ;;  %v4919_v59 = vshrl.u32 %v4858_v10, 16 }
  0x26   :  { %3814 = vmatprep.subr.bf16.mxu1 %v4492_v4  ;;  %v1450_v63 = vsel %vm1419_vm1, %v1445_v39, %v1449_v50 }
  0x27   :  { %3815 = vmatpush3.bf16.msra.mxu1 %v4492_v4  ;;  %v1763_v4 = vrot.slane %v4652_v12, 6  ;;  %5640 = vst [vmem:[#allocation2_spill] sm:$0xff] %v4851_v7 }
  0x28   :  { %4007 = vmatpush3.bf16.msra.mxu0 %v4489_v62  ;;  %3816 = vmatprep.subr.bf16.mxu1 %v4497_v11  ;;  %v4837_v62 = vshll.u32 %v4820_v47, 16 }
  0x29   :  { %4008 = vmatprep.subr.bf16.mxu0 %v4493_v16 }
  0x2a   :  { %3785 = vmatmul.mubr.bf16.gmra.mrb[4].mxu1 %v258_v23  ;;  %v297_v9 = vrot.slane %v4837_v62, 1  ;;  %v4515_v23 = vld [vmem:[%s5633_s2 + $0x30] sm:$0xff]  }
  0x2b   :  { %3977 = vmatmul.mubr.bf16.gmra.mrb[4].mxu0 %v1438_v28  ;;  %3788 = vmatprep.mubr.bf16.mxu1 %v266_v29  ;;  %v1454_v28 = vsel %vm1419_vm1, %v1449_v50, %v4851_v7  ;;  %v4903_v50 = vld [vmem:[%s5634_s0 + $0x68] sm:$0xff]   ;;  %v2388_v7 = vrot.slane %v4716_v44, 2  ;;  %v5026_v44 = vld [vmem:[%s5633_s2 + $0x1c0] sm:$0xff]  }
  0x2c   :  { %4009 = vmatpush3.bf16.msra.mxu0 %v4493_v16  ;;  %3980 = vmatprep.mubr.bf16.mxu0 %v1442_v31  ;;  %v1764_v16 = vrot.slane %v4657_v13, 6  ;;  %v298_v29 = vsel %vm222_vm0, %v293_v8, %v297_v9  ;;  %v4881_v31 = vshll.u32 %v4858_v10, 16  ;;  %v301_v39 = vor.u32 %v4872_v25, %v297_v9  ;;  %v4937_v9 = vld [vmem:[%s5634_s0 + $0x70] sm:$0xff]  }
  0x2d   :  { %4010 = vmatprep.subr.bf16.mxu0 %v4494_v30  ;;  %3817 = vmatpush3.bf16.msra.mxu1 %v4497_v11  ;;  %v4503_v11 = vld [vmem:[%s5633_s2 + $0x170] sm:$0xff]  }
  0x2e   :  { %3818 = vmatprep.subr.bf16.mxu1 %v4502_v35  ;;  %v1765_v33 = vsel %vm1762_vm2, %v1763_v4, %v1764_v16  ;;  %v1767_v60 = vsel %vm1762_vm2, %v1764_v16, %v1766_v45  ;;  %v4512_v4 = vld [vmem:[%s5633_s2 + $0x188] sm:$0xff]   ;;  %v1770_v16 = vrot.slane %v4704_v38, 6 }
  0x30   :  { %4011 = vmatpush3.bf16.msra.mxu0 %v4494_v30  ;;  %v4878_v30 = vshrl.u32 %v4843_v0, 16 }
  0x31   :  { %4012 = vmatprep.subr.bf16.mxu0 %v4498_v48  ;;  %3819 = vmatpush3.bf16.msra.mxu1 %v4502_v35  ;;  %v305_v35 = vrot.slane %v4865_v19, 1 }
  0x32   :  { %3789 = vmatmul.mubr.bf16.gmra.mrb[8].mxu1 %v274_v52  ;;  %3820 = vmatprep.subr.bf16.mxu1 %v4507_v51  ;;  %v1768_v52 = vrot.slane %v4698_v36, 6 }
  0x33   :  { %3981 = vmatmul.mubr.bf16.gmra.mrb[8].mxu0 %v1446_v53  ;;  %3792 = vmatprep.mubr.bf16.mxu1 %v282_v56  ;;  %v309_v46 = vor.u32 %v4878_v30, %v305_v35  ;;  %v4910_v53 = vshll.u32 %v4890_v34, 16  ;;  %v306_v56 = vsel %vm222_vm0, %v301_v39, %v305_v35 }
  0x34   :  { %4013 = vmatpush3.bf16.msra.mxu0 %v4498_v48  ;;  %3984 = vmatprep.mubr.bf16.mxu0 %v1450_v63  ;;  %v313_v48 = vrot.slane %v4881_v31, 1  ;;  %v1769_v3 = vsel %vm1762_vm2, %v1766_v45, %v1768_v52  ;;  %v1771_v39 = vsel %vm1762_vm2, %v1768_v52, %v1770_v16 }
  0x35   :  { %4014 = vmatprep.subr.bf16.mxu0 %v4499_v55  ;;  %3821 = vmatpush3.bf16.msra.mxu1 %v4507_v51  ;;  %v4508_v51 = vld [vmem:[%s5633_s2 + $0x180] sm:$0xff]   ;;  %v321_v8 = vrot.slane %v4910_v53, 1 }
  0x36   :  { %3822 = vmatprep.subr.bf16.mxu1 %v4511_v2  ;;  %v314_v63 = vsel %vm222_vm0, %v309_v46, %v313_v48  ;;  %v4963_v46 = vshrl.u32 %v4937_v9, 16 }
  0x38   :  { %4015 = vmatpush3.bf16.msra.mxu0 %v4499_v55  ;;  %v4915_v55 = vld [vmem:[%s5633_s2 + $0x80] sm:$0xff]  }
  0x39   :  { %4016 = vmatprep.subr.bf16.mxu0 %v4503_v11  ;;  %3823 = vmatpush3.bf16.msra.mxu1 %v4511_v2  ;;  %v4927_v2 = vshll.u32 %v4903_v50, 16 }
  0x3a   :  { %3793 = vmatmul.mubr.bf16.gmra.mrb[12].mxu1 %v290_v24  ;;  %3824 = vmatprep.subr.bf16.mxu1 %v4515_v23 }
  0x3b   :  { %3985 = vmatmul.mubr.bf16.gmra.mrb[12].mxu0 %v1454_v28  ;;  %3796 = vmatprep.mubr.bf16.mxu1 %v298_v29  ;;  %v329_v24 = vrot.slane %v4927_v2, 1  ;;  %v4947_v28 = vld [vmem:[%s5634_s0 + $0x78] sm:$0xff]   ;;  %v1772_v29 = vrot.slane %v4735_v54, 6 }
  0x3c   :  { %4017 = vmatpush3.bf16.msra.mxu0 %v4503_v11  ;;  %4020 = vmatprep.mubr.bf16.mxu0 %v1765_v33  ;;  %v317_v11 = vor.u32 %v4919_v59, %v313_v48  ;;  %v4954_v33 = vshll.u32 %v4937_v9, 16  ;;  %v4966_v48 = vshll.u32 %v4947_v28, 16 }
  0x3d   :  { %4018 = vmatprep.subr.bf16.mxu0 %v4504_v32  ;;  %3825 = vmatpush3.bf16.msra.mxu1 %v4515_v23  ;;  %v325_v23 = vor.u32 %v4924_v1, %v321_v8 }
  0x3e   :  { %3826 = vmatprep.subr.bf16.mxu1 %v4519_v37  ;;  %v322_v35 = vsel %vm222_vm0, %v317_v11, %v321_v8  ;;  %v345_v8 = vrot.slane %v4966_v48, 1  ;;  %v1776_v11 = vrot.slane %v4777_v15, 6 }
  0x3f   :  { %v330_v45 = vsel %vm222_vm0, %v325_v23, %v329_v24 }
  0x40   :  { %4019 = vmatpush3.bf16.msra.mxu0 %v4504_v32  ;;  %v4516_v32 = vld [vmem:[%s5633_s2 + $0x190] sm:$0xff]  }
  0x41   :  { %4052 = vmatprep.subr.bf16.mxu0 %v4508_v51  ;;  %3827 = vmatpush3.bf16.msra.mxu1 %v4519_v37  ;;  %v4958_v37 = vshrl.u32 %v4903_v50, 16 }
  0x42   :  { %3797 = vmatmul.mubr.bf16.gmra.mrb[16].mxu1 %v306_v56  ;;  %3860 = vmatprep.subr.bf16.mxu1 %v4915_v55  ;;  %v4520_v56 = vld [vmem:[%s5633_s2 + $0x198] sm:$0xff]  }
  0x43   :  { %4021 = vmatmul.mubr.bf16.vlgmr.msra.gmra.mrb[0].mxu0 %v1767_v60  ;;  %3800 = vmatprep.mubr.bf16.mxu1 %v314_v63  ;;  %v337_v60 = vrot.slane %v4954_v33, 1  ;;  %v333_v52 = vor.u32 %v4958_v37, %v329_v24  ;;  %v4977_v63 = vld [vmem:[%s5635_s1 + $0x80] sm:$0xff]   ;;  %v4988_v24 = vshrl.u32 %v4947_v28, 16 }
  0x44   :  { %4053 = vmatpush3.bf16.msra.mxu0 %v4508_v51  ;;  %4024 = vmatprep.mubr.bf16.mxu0 %v1769_v3  ;;  %v1773_v51 = vsel %vm1762_vm2, %v1770_v16, %v1772_v29  ;;  %v1774_v3 = vrot.slane %v4749_v61, 6  ;;  %v4522_v16 = vld [vmem:[%s5633_s2 + $0x1a0] sm:$0xff]  }
  0x45   :  { %4054 = vmatprep.subr.bf16.mxu0 %v4512_v4  ;;  %v338_v23 = vsel %vm222_vm0, %v333_v52, %v337_v60 }
  0x48   :  { %4055 = vmatpush3.bf16.msra.mxu0 %v4512_v4  ;;  %v341_v4 = vor.u32 %v4963_v46, %v337_v60  ;;  %v349_v60 = vor.u32 %v4988_v24, %v345_v8 }
  0x49   :  { %4056 = vmatprep.subr.bf16.mxu0 %v4516_v32 }
  0x4a   :  { %3801 = vmatmul.mubr.bf16.gmra.mrb[20].mxu1 %v322_v35  ;;  %v4991_v35 = vshll.u32 %v4977_v63, 16 }
  0x4b   :  { %4025 = vmatmul.mubr.bf16.gmra.mrb[4].mxu0 %v1771_v39  ;;  %3804 = vmatprep.mubr.bf16.mxu1 %v330_v45  ;;  %v346_v39 = vsel %vm222_vm0, %v341_v4, %v345_v8  ;;  %v1777_v45 = vsel %vm1762_vm2, %v1774_v3, %v1776_v11  ;;  %v4528_v8 = vld [vmem:[%s5633_s2 + $0x1b8] sm:$0xff]  }
  0x4c   :  { %4028 = vmatprep.mubr.bf16.mxu0 %v1773_v51  ;;  %4057 = vmatpush3.bf16.msra.mxu0 %v4516_v32  ;;  %v1775_v32 = vsel %vm1762_vm2, %v1772_v29, %v1774_v3  ;;  %v4524_v51 = vld [vmem:[%s5633_s2 + $0x1a8] sm:$0xff]   ;;  %v353_v52 = vrot.slane %v4991_v35, 1  ;;  %v1778_v29 = vrot.slane %v4794_v27, 6  ;;  %v4526_v3 = vld [vmem:[%s5633_s2 + $0x1b0] sm:$0xff]  }
  0x4d   :  { %4058 = vmatprep.subr.bf16.mxu0 %v4520_v56 }
  0x4e   :  { %v354_v4 = vsel %vm222_vm0, %v349_v60, %v353_v52  ;;  %v2392_v60 = vrot.slane %v4742_v58, 2  ;;  %v2396_v52 = vrot.slane %v4766_v6, 2  ;;  %v2404_v6 = vrot.slane %v4813_v43, 2 }
  0x50   :  { %4059 = vmatpush3.bf16.msra.mxu0 %v4520_v56  ;;  %v1780_v56 = vrot.slane %v4820_v47, 6 }
  0x51   :  { %4060 = vmatprep.subr.bf16.mxu0 %v4522_v16 }
  0x52   :  { %3805 = vmatmul.mubr.bf16.gmra.mrb[24].mxu1 %v338_v23  ;;  %v1779_v23 = vsel %vm1762_vm2, %v1776_v11, %v1778_v29 }
  0x53   :  { %4029 = vmatmul.mubr.bf16.gmra.mrb[8].mxu0 %v1775_v32  ;;  %3808 = vmatprep.mubr.bf16.mxu1 %v346_v39  ;;  %v1781_v32 = vsel %vm1762_vm2, %v1778_v29, %v1780_v56  ;;  %v2385_v39 = vrot.slane %v4708_v40, 3  ;;  %v2393_v40 = vrot.slane %v4739_v57, 3  ;;  %v2401_v57 = vrot.slane %v4783_v20, 3 }
  0x54   :  { %4032 = vmatprep.mubr.bf16.mxu0 %v1777_v45  ;;  %4061 = vmatpush3.bf16.msra.mxu0 %v4522_v16  ;;  %v2384_v16 = vrot.slane %v4711_v41, 2  ;;  %v1782_v45 = vrot.slane %v4843_v0, 6  ;;  %v1784_v41 = vrot.slane %v4858_v10, 6  ;;  %v2405_v20 = vrot.slane %v4810_v42, 3  ;;  %v4525_v42 = vld [vmem:[%s5633_s2 + $0x90] sm:$0xff]  }
  0x55   :  { %4062 = vmatprep.subr.bf16.mxu0 %v4524_v51  ;;  %v2394_v29 = vor.u32 %v2393_v40, %v2392_v60  ;;  %v4527_v60 = vld [vmem:[%s5633_s2 + $0x98] sm:$0xff]   ;;  %v1790_v40 = vrot.slane %v4937_v9, 6 }
  0x56   :  { %v5017_v11 = vor.u32 %v2385_v39, %v2384_v16  ;;  %v1786_v16 = vrot.slane %v4890_v34, 6  ;;  %v1788_v39 = vrot.slane %v4903_v50, 6 }
  0x58   :  { %4063 = vmatpush3.bf16.msra.mxu0 %v4524_v51  ;;  %v2389_v51 = vrot.slane %v4724_v49, 3  ;;  %v2397_v49 = vrot.slane %v4763_v5, 3  ;;  %v4523_v5 = vld [vmem:[%s5633_s2 + $0x88] sm:$0xff]  }
  0x59   :  { %4064 = vmatprep.subr.bf16.mxu0 %v4526_v3 }
  0x5a   :  { %3809 = vmatmul.mubr.bf16.gmra.mrb[28].mxu1 %v354_v4  ;;  %v1783_v4 = vsel %vm1762_vm2, %v1780_v56, %v1782_v45 }
  0x5b   :  { %4033 = vmatmul.mubr.bf16.gmra.mrb[12].mxu0 %v1779_v23  ;;  %3828 = vmatprep.mubr.bf16.mxu1 %v4652_v12  ;;  %v2390_v12 = vor.u32 %v2389_v51, %v2388_v7  ;;  %v2398_v7 = vor.u32 %v2397_v49, %v2396_v52  ;;  %v1789_v51 = vsel %vm1762_vm2, %v1786_v16, %v1788_v39  ;;  %v4531_v49 = vld [vmem:[%s5633_s2 + $0xa8] sm:$0xff]  }
  0x5c   :  { %4036 = vmatprep.mubr.bf16.mxu0 %v1781_v32  ;;  %4065 = vmatpush3.bf16.msra.mxu0 %v4526_v3  ;;  %v2400_v3 = vrot.slane %v4789_v26, 2  ;;  %v1785_v32 = vsel %vm1762_vm2, %v1782_v45, %v1784_v41  ;;  %v1787_v45 = vsel %vm1762_vm2, %v1784_v41, %v1786_v16  ;;  %v4529_v41 = vld [vmem:[%s5633_s2 + $0xa0] sm:$0xff]   ;;  %v1791_v52 = vsel %vm1762_vm2, %v1788_v39, %v1790_v40  ;;  %v4534_v39 = vld [vmem:[%s5633_s2 + $0x1d0] sm:$0xff]  }
  0x5d   :  { %4066 = vmatprep.subr.bf16.mxu0 %v4528_v8  ;;  %v5032_v58 = vsel %vm2376_vm3, %v5017_v11, %v2390_v12  ;;  %v5038_v23 = vsel %vm2376_vm3, %v2390_v12, %v2394_v29  ;;  %v5049_v56 = vsel %vm2376_vm3, %v2394_v29, %v2398_v7  ;;  %v1792_v12 = vrot.slane %v4947_v28, 6 }
  0x5e   :  { %v2402_v26 = vor.u32 %v2401_v57, %v2400_v3  ;;  %v1794_v3 = vrot.slane %v4977_v63, 6  ;;  %v2070_v57 = vrot.slane %v4657_v13, 2 }
  0x5f   :  { %v1793_v29 = vsel %vm1762_vm2, %v1790_v40, %v1792_v12  ;;  %v4538_v40 = vld [vmem:[%s5633_s2 + $0x1e0] sm:$0xff]  }
  0x60   :  { %4067 = vmatpush3.bf16.msra.mxu0 %v4528_v8  ;;  %v5053_v43 = vsel %vm2376_vm3, %v2398_v7, %v2402_v26  ;;  %v5055_v8 = vor.u32 %v2405_v20, %v2404_v6  ;;  %v4533_v7 = vld [vmem:[%s5633_s2 + $0xb0] sm:$0xff]   ;;  %v1795_v6 = vsel %vm1762_vm2, %v1792_v12, %v1794_v3 }
  0x61   :  { %4100 = vmatprep.subr.bf16.mxu0 %v5026_v44 }
  0x62   :  { %3829 = vmatmul.mubr.bf16.vlgmr.msra.gmra.mrb[0].mxu1 %v4657_v13  ;;  %v2073_v13 = vrot.slane %v4698_v36, 2 }
  0x63   :  { %4037 = vmatmul.mubr.bf16.gmra.mrb[16].mxu0 %v1783_v4  ;;  %3861 = vmatpush3.bf16.msra.mxu1 %v4915_v55  ;;  %v5065_v55 = vsel %vm2376_vm3, %v2402_v26, %v5055_v8  ;;  %v2071_v4 = vrot.slane %v4662_v14, 2  ;;  %v5104_v26 = vld [vmem:[%s5633_s2 + $0xc0] sm:$0xff]  }
  0x64   :  { %3832 = vmatprep.mubr.bf16.mxu1 %v4662_v14  ;;  %4040 = vmatprep.mubr.bf16.mxu0 %v1785_v32  ;;  %v2075_v14 = vrot.slane %v4704_v38, 2 }
  0x65   :  { %3862 = vmatprep.subr.bf16.mxu1 %v4523_v5  ;;  %v2072_v32 = vsel %vm2069_vm4, %v2070_v57, %v2071_v4  ;;  %v2074_v20 = vsel %vm2069_vm4, %v2071_v4, %v2073_v13  ;;  %v5149_v57 = vld [vmem:[%s5634_s0 + $0x8] sm:$0xff]  }
  0x66   :  { %v2076_v16 = vsel %vm2069_vm4, %v2073_v13, %v2075_v14  ;;  %v807_v4 = vrot.slane %v5149_v57, 1 }
  0x67   :  { %3863 = vmatpush3.bf16.msra.mxu1 %v4523_v5  ;;  %v4535_v5 = vld [vmem:[%s5633_s2 + $0xb8] sm:$0xff]  }
  0x68   :  { %3864 = vmatprep.subr.bf16.mxu1 %v4525_v42 }
  0x6a   :  { %3833 = vmatmul.mubr.bf16.gmra.mrb[4].mxu1 %v4698_v36  ;;  %v2077_v36 = vrot.slane %v4735_v54, 2 }
  0x6b   :  { %4041 = vmatmul.mubr.bf16.gmra.mrb[20].mxu0 %v1787_v45  ;;  %3836 = vmatprep.mubr.bf16.mxu1 %v4704_v38  ;;  %v2079_v38 = vrot.slane %v4749_v61, 2 }
  0x6c   :  { %4044 = vmatprep.mubr.bf16.mxu0 %v1789_v51  ;;  %3865 = vmatpush3.bf16.msra.mxu1 %v4525_v42  ;;  %v4532_v42 = vld [vmem:[%s5633_s2 + $0x1c8] sm:$0xff]   ;;  %v2078_v45 = vsel %vm2069_vm4, %v2075_v14, %v2077_v36  ;;  %v4545_v14 = vld [vmem:[%s5633_s2 + $0x1f8] sm:$0xff]  }
  0x6d   :  { %3866 = vmatprep.subr.bf16.mxu1 %v4527_v60  ;;  %v2080_v51 = vsel %vm2069_vm4, %v2077_v36, %v2079_v38  ;;  %v5173_v36 = vld [vmem:[%s5634_s0 + $0x18] sm:$0xff]  }
  0x70   :  { %3867 = vmatpush3.bf16.msra.mxu1 %v4527_v60  ;;  %v2083_v60 = vrot.slane %v4794_v27, 2 }
  0x71   :  { %3868 = vmatprep.subr.bf16.mxu1 %v4529_v41 }
  0x72   :  { %3837 = vmatmul.mubr.bf16.gmra.mrb[8].mxu1 %v4735_v54  ;;  %v2081_v54 = vrot.slane %v4777_v15, 2 }
  0x73   :  { %4045 = vmatmul.mubr.bf16.gmra.mrb[24].mxu0 %v1791_v52  ;;  %3840 = vmatprep.mubr.bf16.mxu1 %v4749_v61  ;;  %v4540_v52 = vld [vmem:[%s5633_s2 + $0x1e8] sm:$0xff]  }
  0x74   :  { %4048 = vmatprep.mubr.bf16.mxu0 %v1793_v29  ;;  %3869 = vmatpush3.bf16.msra.mxu1 %v4529_v41  ;;  %v2082_v12 = vsel %vm2069_vm4, %v2079_v38, %v2081_v54  ;;  %v2084_v41 = vsel %vm2069_vm4, %v2081_v54, %v2083_v60  ;;  %v2085_v29 = vrot.slane %v4820_v47, 2  ;;  %v811_v38 = vrot.slane %v5173_v36, 1 }
  0x75   :  { %3870 = vmatprep.subr.bf16.mxu1 %v4531_v49 }
  0x78   :  { %3871 = vmatpush3.bf16.msra.mxu1 %v4531_v49  ;;  %v5143_v49 = vld [vmem:[%s5634_s0] sm:$0xff]  }
  0x79   :  { %3872 = vmatprep.subr.bf16.mxu1 %v4533_v7  ;;  %v806_v3 = vrot.slane %v5143_v49, 1 }
  0x7a   :  { %3841 = vmatmul.mubr.bf16.gmra.mrb[12].mxu1 %v4777_v15 }
  0x7b   :  { %4049 = vmatmul.mubr.bf16.gmra.mrb[28].mxu0 %v1795_v6  ;;  %3844 = vmatprep.mubr.bf16.mxu1 %v4794_v27  ;;  %v4542_v6 = vld [vmem:[%s5633_s2 + $0x1f0] sm:$0xff]  }
  0x7c   :  { %4068 = vmatprep.mubr.bf16.mxu0 %v2072_v32  ;;  %3873 = vmatpush3.bf16.msra.mxu1 %v4533_v7  ;;  %v2087_v7 = vrot.slane %v4843_v0, 2  ;;  %v2086_v32 = vsel %vm2069_vm4, %v2083_v60, %v2085_v29 }
  0x7d   :  { %3874 = vmatprep.subr.bf16.mxu1 %v4535_v5 }
  0x7e   :  { %v2088_v13 = vsel %vm2069_vm4, %v2085_v29, %v2087_v7  ;;  %v5201_v29 = vld [vmem:[%s5634_s0 + $0x28] sm:$0xff]  }
  0x80   :  { %3875 = vmatpush3.bf16.msra.mxu1 %v4535_v5  ;;  %v808_v5 = vsel %vm805_vm5, %v806_v3, %v807_v4  ;;  %v815_v3 = vrot.slane %v5201_v29, 1 }
  0x81   :  { %3908 = vmatprep.subr.bf16.mxu1 %v5104_v26 }
  0x82   :  { %3845 = vmatmul.mubr.bf16.gmra.mrb[16].mxu1 %v4820_v47 }
  0x83   :  { %4069 = vmatmul.mubr.bf16.vlgmr.msra.gmra.mrb[0].mxu0 %v2074_v20  ;;  %3848 = vmatprep.mubr.bf16.mxu1 %v4843_v0  ;;  %v5166_v20 = vld [vmem:[%s5634_s0 + $0x10] sm:$0xff]  }
  0x84   :  { %4101 = vmatpush3.bf16.msra.mxu0 %v5026_v44  ;;  %4072 = vmatprep.mubr.bf16.mxu0 %v2076_v16  ;;  %v4536_v44 = vld [vmem:[%s5633_s2 + $0x1d8] sm:$0xff]   ;;  %v809_v16 = vrot.slane %v5166_v20, 1 }
  0x85   :  { %4102 = vmatprep.subr.bf16.mxu0 %v4532_v42 }
  0x86   :  { %v812_v54 = vsel %vm805_vm5, %v809_v16, %v811_v38 }
  0x88   :  { %4103 = vmatpush3.bf16.msra.mxu0 %v4532_v42  ;;  %v2089_v42 = vrot.slane %v4858_v10, 2 }
  0x89   :  { %4104 = vmatprep.subr.bf16.mxu0 %v4534_v39 }
  0x8a   :  { %3849 = vmatmul.mubr.bf16.gmra.mrb[20].mxu1 %v4858_v10 }
  0x8b   :  { %4073 = vmatmul.mubr.bf16.gmra.mrb[4].mxu0 %v2078_v45  ;;  %3852 = vmatprep.mubr.bf16.mxu1 %v4890_v34  ;;  %v5180_v45 = vld [vmem:[%s5633_s2 + $0x200] sm:$0xff]  }
  0x8c   :  { %4076 = vmatprep.mubr.bf16.mxu0 %v2080_v51  ;;  %4105 = vmatpush3.bf16.msra.mxu0 %v4534_v39  ;;  %v2091_v39 = vrot.slane %v4890_v34, 2  ;;  %v810_v51 = vsel %vm805_vm5, %v807_v4, %v809_v16  ;;  %v2095_v4 = vrot.slane %v4937_v9, 2  ;;  %v2097_v16 = vrot.slane %v4947_v28, 2 }
  0x8d   :  { %4106 = vmatprep.subr.bf16.mxu0 %v4536_v44 }
  0x8e   :  { %v2092_v60 = vsel %vm2069_vm4, %v2089_v42, %v2091_v39 }
  0x90   :  { %4107 = vmatpush3.bf16.msra.mxu0 %v4536_v44  ;;  %v2090_v44 = vsel %vm2069_vm4, %v2087_v7, %v2089_v42  ;;  %v819_v42 = vrot.slane %v4777_v15, 1  ;;  %v2377_v15 = vrot.slane %v4670_v18, 2  ;;  %v823_v18 = vrot.slane %v4820_v47, 1  ;;  %v4552_v47 = vld [vmem:[%s5633_s2 + $0xf8] sm:$0xff]  }
  0x91   :  { %4108 = vmatprep.subr.bf16.mxu0 %v4538_v40 }
  0x92   :  { %3853 = vmatmul.mubr.bf16.gmra.mrb[24].mxu1 %v4903_v50 }
  0x93   :  { %4077 = vmatmul.mubr.bf16.gmra.mrb[8].mxu0 %v2082_v12  ;;  %3856 = vmatprep.mubr.bf16.mxu1 %v4937_v9  ;;  %v5194_v12 = vld [vmem:[%s5634_s0 + $0x20] sm:$0xff]  }
  0x94   :  { %4080 = vmatprep.mubr.bf16.mxu0 %v2084_v41  ;;  %4109 = vmatpush3.bf16.msra.mxu0 %v4538_v40  ;;  %v4539_v40 = vld [vmem:[%s5633_s2 + $0xc8] sm:$0xff]   ;;  %v813_v41 = vrot.slane %v5194_v12, 1 }
  0x95   :  { %4110 = vmatprep.subr.bf16.mxu0 %v4540_v52 }
  0x96   :  { %v814_v7 = vsel %vm805_vm5, %v811_v38, %v813_v41  ;;  %v2099_v38 = vrot.slane %v4977_v63, 2 }
  0x98   :  { %4111 = vmatpush3.bf16.msra.mxu0 %v4540_v52  ;;  %v2093_v52 = vrot.slane %v4903_v50, 2 }
  0x99   :  { %4112 = vmatprep.subr.bf16.mxu0 %v4542_v6 }
  0x9a   :  { %3857 = vmatmul.mubr.bf16.gmra.mrb[28].mxu1 %v4947_v28 }
  0x9b   :  { %4081 = vmatmul.mubr.bf16.gmra.mrb[12].mxu0 %v2086_v32  ;;  %3876 = vmatprep.mubr.bf16.mxu1 %v808_v5  ;;  %v816_v32 = vsel %vm805_vm5, %v813_v41, %v815_v3  ;;  %v2096_v5 = vsel %vm2069_vm4, %v2093_v52, %v2095_v4  ;;  %v2380_v41 = vrot.slane %v4682_v22, 2 }
  0x9c   :  { %4084 = vmatprep.mubr.bf16.mxu0 %v2088_v13  ;;  %4113 = vmatpush3.bf16.msra.mxu0 %v4542_v6  ;;  %v2094_v6 = vsel %vm2069_vm4, %v2091_v39, %v2093_v52  ;;  %v4543_v13 = vld [vmem:[%s5633_s2 + $0xd8] sm:$0xff]   ;;  %v4546_v39 = vld [vmem:[%s5633_s2 + $0xe0] sm:$0xff]   ;;  %v2381_v52 = vrot.slane %v4679_v21, 3  ;;  %v4550_v21 = vld [vmem:[%s5633_s2 + $0xf0] sm:$0xff]  }
  0x9d   :  { %4114 = vmatprep.subr.bf16.mxu0 %v4545_v14 }
  0x9e   :  { %v2382_v22 = vor.u32 %v2381_v52, %v2380_v41  ;;  %v1113_v52 = vrot.slane %v5143_v49, 5  ;;  %v2417_v49 = vrot.slane %v4881_v31, 3 }
  0xa0   :  { %4115 = vmatpush3.bf16.msra.mxu0 %v4545_v14  ;;  %v817_v14 = vrot.slane %v4749_v61, 1  ;;  %v2100_v61 = vsel %vm2069_vm4, %v2097_v16, %v2099_v38 }
  0xa1   :  { %4148 = vmatprep.subr.bf16.mxu0 %v5180_v45 }
  0xa2   :  { %3877 = vmatmul.mubr.bf16.vlgmr.msra.gmra.mrb[0].mxu1 %v810_v51  ;;  %v818_v51 = vsel %vm805_vm5, %v815_v3, %v817_v14  ;;  %v4548_v3 = vld [vmem:[%s5633_s2 + $0xe8] sm:$0xff]  }
  0xa3   :  { %4085 = vmatmul.mubr.bf16.gmra.mrb[16].mxu0 %v2090_v44  ;;  %3909 = vmatpush3.bf16.msra.mxu1 %v5104_v26  ;;  %v4541_v26 = vld [vmem:[%s5633_s2 + $0xd0] sm:$0xff]   ;;  %v2098_v44 = vsel %vm2069_vm4, %v2095_v4, %v2097_v16  ;;  %v2387_v16 = vsel %vm2376_vm3, %v2382_v22, %v5017_v11  ;;  %v831_v11 = vrot.slane %v4903_v50, 1  ;;  %v833_v50 = vrot.slane %v4937_v9, 1 }
  0xa4   :  { %3880 = vmatprep.mubr.bf16.mxu1 %v812_v54  ;;  %4088 = vmatprep.mubr.bf16.mxu0 %v2092_v60  ;;  %v820_v54 = vsel %vm805_vm5, %v817_v14, %v819_v42  ;;  %v5229_v60 = vld [vmem:[%s5635_s1 + $0x88] sm:$0xff]   ;;  %v2412_v9 = vrot.slane %v4878_v30, 2 }
  0xa5   :  { %3910 = vmatprep.subr.bf16.mxu1 %v4539_v40  ;;  %v2101_v4 = vrot.slane %v5229_v60, 2 }
  0xa7   :  { %3911 = vmatpush3.bf16.msra.mxu1 %v4539_v40  ;;  %v2378_v40 = vrot.slane %v4667_v17, 3 }
  0xa8   :  { %3912 = vmatprep.subr.bf16.mxu1 %v4541_v26 }
  0xa9   :  { %v2379_v17 = vor.u32 %v2378_v40, %v2377_v15  ;;  %v2408_v15 = vrot.slane %v4872_v25, 2  ;;  %v837_v40 = vrot.slane %v4977_v63, 1 }
  0xaa   :  { %3881 = vmatmul.mubr.bf16.gmra.mrb[4].mxu1 %v814_v7 }
  0xab   :  { %4089 = vmatmul.mubr.bf16.gmra.mrb[20].mxu0 %v2094_v6  ;;  %3884 = vmatprep.mubr.bf16.mxu1 %v816_v32  ;;  %v2102_v6 = vsel %vm2069_vm4, %v2099_v38, %v2101_v4  ;;  %v4549_v38 = vld [vmem:[%s5633_s2 + $0x208] sm:$0xff]   ;;  %v4556_v4 = vld [vmem:[%s5633_s2 + $0x230] sm:$0xff]  }
  0xac   :  { %4092 = vmatprep.mubr.bf16.mxu0 %v2096_v5  ;;  %3913 = vmatpush3.bf16.msra.mxu1 %v4541_v26  ;;  %v821_v26 = vrot.slane %v4794_v27, 1  ;;  %v2383_v27 = vsel %vm2376_vm3, %v2379_v17, %v2382_v22  ;;  %v825_v5 = vrot.slane %v4843_v0, 1  ;;  %v5263_v0 = vld [vmem:[%s5633_s2 + $0x100] sm:$0xff]   ;;  %v2416_v17 = vrot.slane %v4919_v59, 2 }
  0xad   :  { %3914 = vmatprep.subr.bf16.mxu1 %v4543_v13 }
  0xae   :  { %v822_v7 = vsel %vm805_vm5, %v819_v42, %v821_v26  ;;  %v824_v32 = vsel %vm805_vm5, %v821_v26, %v823_v18  ;;  %v826_v14 = vsel %vm805_vm5, %v823_v18, %v825_v5 }
  0xb0   :  { %3915 = vmatpush3.bf16.msra.mxu1 %v4543_v13  ;;  %v827_v13 = vrot.slane %v4858_v10, 1  ;;  %v829_v10 = vrot.slane %v4890_v34, 1  ;;  %v4553_v34 = vld [vmem:[%s5633_s2 + $0x218] sm:$0xff]  }
  0xb1   :  { %3916 = vmatprep.subr.bf16.mxu1 %v4546_v39 }
  0xb2   :  { %3885 = vmatmul.mubr.bf16.gmra.mrb[8].mxu1 %v818_v51  ;;  %v828_v42 = vsel %vm805_vm5, %v825_v5, %v827_v13  ;;  %v830_v51 = vsel %vm805_vm5, %v827_v13, %v829_v10 }
  0xb3   :  { %4093 = vmatmul.mubr.bf16.gmra.mrb[24].mxu0 %v2098_v44  ;;  %3888 = vmatprep.mubr.bf16.mxu1 %v820_v54  ;;  %v832_v44 = vsel %vm805_vm5, %v829_v10, %v831_v11  ;;  %v834_v54 = vsel %vm805_vm5, %v831_v11, %v833_v50  ;;  %v2428_v10 = vrot.slane %v4963_v46, 2  ;;  %v2429_v11 = vrot.slane %v4954_v33, 3 }
  0xb4   :  { %4096 = vmatprep.mubr.bf16.mxu0 %v2100_v61  ;;  %3917 = vmatpush3.bf16.msra.mxu1 %v4546_v39  ;;  %v4551_v39 = vld [vmem:[%s5633_s2 + $0x210] sm:$0xff]  }
  0xb5   :  { %3918 = vmatprep.subr.bf16.mxu1 %v4548_v3 }
  0xb8   :  { %3919 = vmatpush3.bf16.msra.mxu1 %v4548_v3  ;;  %v1114_v3 = vrot.slane %v5149_v57, 5 }
  0xb9   :  { %3920 = vmatprep.subr.bf16.mxu1 %v4550_v21 }
  0xba   :  { %3889 = vmatmul.mubr.bf16.gmra.mrb[12].mxu1 %v822_v7  ;;  %v2421_v7 = vrot.slane %v4910_v53, 3 }
  0xbb   :  { %4097 = vmatmul.mubr.bf16.gmra.mrb[28].mxu0 %v2102_v6  ;;  %3892 = vmatprep.mubr.bf16.mxu1 %v824_v32  ;;  %v4557_v6 = vld [vmem:[%s5633_s2 + $0x238] sm:$0xff]   ;;  %v2418_v32 = vor.u32 %v2417_v49, %v2416_v17 }
  0xbc   :  { %4116 = vmatprep.mubr.bf16.mxu0 %v2383_v27  ;;  %3921 = vmatpush3.bf16.msra.mxu1 %v4550_v21  ;;  %v2420_v21 = vrot.slane %v4924_v1, 2  ;;  %v1118_v27 = vrot.slane %v5173_v36, 5 }
  0xbd   :  { %3922 = vmatprep.subr.bf16.mxu1 %v4552_v47 }
  0xc0   :  { %3923 = vmatpush3.bf16.msra.mxu1 %v4552_v47  ;;  %v2422_v47 = vor.u32 %v2421_v7, %v2420_v21 }
  0xc1   :  { %4196 = vmatprep.subr.bf16.mxu1 %v5263_v0 }
  0xc2   :  { %3893 = vmatmul.mubr.bf16.gmra.mrb[16].mxu1 %v826_v14  ;;  %v2424_v14 = vrot.slane %v4958_v37, 2 }
  0xc3   :  { %4117 = vmatmul.mubr.bf16.vlgmr.msra.gmra.mrb[0].mxu0 %v2387_v16  ;;  %3896 = vmatprep.mubr.bf16.mxu1 %v828_v42  ;;  %v2425_v16 = vrot.slane %v4927_v2, 3 }
  0xc4   :  { %4149 = vmatpush3.bf16.msra.mxu0 %v5180_v45  ;;  %4120 = vmatprep.mubr.bf16.mxu0 %v5032_v58  ;;  %v835_v58 = vrot.slane %v4947_v28, 1  ;;  %v4554_v45 = vld [vmem:[%s5633_s2 + $0x220] sm:$0xff]   ;;  %v4555_v28 = vld [vmem:[%s5633_s2 + $0x228] sm:$0xff]  }
  0xc5   :  { %4150 = vmatprep.subr.bf16.mxu0 %v4549_v38 }
  0xc6   :  { %v836_v61 = vsel %vm805_vm5, %v833_v50, %v835_v58  ;;  %v2430_v50 = vor.u32 %v2429_v11, %v2428_v10 }
  0xc8   :  { %4151 = vmatpush3.bf16.msra.mxu0 %v4549_v38  ;;  %v2423_v38 = vsel %vm2376_vm3, %v2418_v32, %v2422_v47 }
  0xc9   :  { %4152 = vmatprep.subr.bf16.mxu0 %v4551_v39 }
  0xca   :  { %3897 = vmatmul.mubr.bf16.gmra.mrb[20].mxu1 %v830_v51  ;;  %v2426_v51 = vor.u32 %v2425_v16, %v2424_v14  ;;  %v2723_v14 = vrot.slane %v5149_v57, 3  ;;  %v2724_v16 = vrot.slane %v5166_v20, 3  ;;  %v4574_v57 = vld [vmem:[%s5633_s2 + $0x130] sm:$0xff]  }
  0xcb   :  { %4121 = vmatmul.mubr.bf16.gmra.mrb[4].mxu0 %v5038_v23  ;;  %3900 = vmatprep.mubr.bf16.mxu1 %v832_v44  ;;  %v2409_v23 = vrot.slane %v4837_v62, 3  ;;  %v1122_v44 = vrot.slane %v5201_v29, 5 }
  0xcc   :  { %4124 = vmatprep.mubr.bf16.mxu0 %v5049_v56  ;;  %4153 = vmatpush3.bf16.msra.mxu0 %v4551_v39  ;;  %v2413_v56 = vrot.slane %v4865_v19, 3  ;;  %v1120_v39 = vrot.slane %v5194_v12, 5 }
  0xcd   :  { %4154 = vmatprep.subr.bf16.mxu0 %v4553_v34  ;;  %v2410_v41 = vor.u32 %v2409_v23, %v2408_v15  ;;  %v2432_v15 = vrot.slane %v4988_v24, 2  ;;  %v2433_v23 = vrot.slane %v4966_v48, 3 }
  0xce   :  { %v2414_v26 = vor.u32 %v2413_v56, %v2412_v9  ;;  %v2431_v9 = vsel %vm2376_vm3, %v2426_v51, %v2430_v50 }
  0xcf   :  { %v2411_v18 = vsel %vm2376_vm3, %v5055_v8, %v2410_v41  ;;  %v1116_v8 = vrot.slane %v5166_v20, 5  ;;  %v5394_v20 = vld [vmem:[%s5634_s0 + $0x50] sm:$0xff]  }
  0xd0   :  { %4155 = vmatpush3.bf16.msra.mxu0 %v4553_v34  ;;  %v2415_v22 = vsel %vm2376_vm3, %v2410_v41, %v2414_v26  ;;  %v2419_v13 = vsel %vm2376_vm3, %v2414_v26, %v2418_v32  ;;  %v4565_v34 = vld [vmem:[%s5633_s2 + $0x108] sm:$0xff]   ;;  %v5370_v32 = vld [vmem:[%s5634_s0 + $0x40] sm:$0xff]  }
  0xd1   :  { %4156 = vmatprep.subr.bf16.mxu0 %v4554_v45  ;;  %v1117_v5 = vsel %vm1112_vm6, %v1114_v3, %v1116_v8  ;;  %v1119_v42 = vsel %vm1112_vm6, %v1116_v8, %v1118_v27  ;;  %v4570_v8 = vld [vmem:[%s5633_s2 + $0x120] sm:$0xff]  }
  0xd2   :  { %3901 = vmatmul.mubr.bf16.gmra.mrb[24].mxu1 %v834_v54  ;;  %v1123_v54 = vsel %vm1112_vm6, %v1120_v39, %v1122_v44 }
  0xd3   :  { %4125 = vmatmul.mubr.bf16.gmra.mrb[8].mxu0 %v5053_v43  ;;  %3904 = vmatprep.mubr.bf16.mxu1 %v836_v61  ;;  %v838_v43 = vsel %vm805_vm5, %v835_v58, %v837_v40  ;;  %v1483_v58 = vshrl.u32 %v4977_v63, 16  ;;  %v4566_v61 = vld [vmem:[%s5633_s2 + $0x110] sm:$0xff]  }
  0xd4   :  { %4128 = vmatprep.mubr.bf16.mxu0 %v5065_v55  ;;  %4157 = vmatpush3.bf16.msra.mxu0 %v4554_v45  ;;  %v1115_v55 = vsel %vm1112_vm6, %v1113_v52, %v1114_v3  ;;  %v1121_v45 = vsel %vm1112_vm6, %v1118_v27, %v1120_v39  ;;  %v5346_v40 = vld [vmem:[%s5634_s0 + $0x30] sm:$0xff]   ;;  %v2434_v52 = vor.u32 %v2433_v23, %v2432_v15  ;;  %v5352_v3 = vld [vmem:[%s5634_s0 + $0x38] sm:$0xff]   ;;  %v1128_v27 = vrot.slane %v5370_v32, 5 }
  0xd5   :  { %4158 = vmatprep.subr.bf16.mxu0 %v4555_v28  ;;  %v2436_v56 = vrot.slane %v1483_v58, 2  ;;  %v1124_v41 = vrot.slane %v5346_v40, 5  ;;  %v1126_v26 = vrot.slane %v5352_v3, 5  ;;  %v2725_v39 = vsel %vm2722_vm7, %v2723_v14, %v2724_v16 }
  0xd6   :  { %v2435_v49 = vsel %vm2376_vm3, %v2430_v50, %v2434_v52 }
  0xd7   :  { %v1125_v17 = vsel %vm1112_vm6, %v1122_v44, %v1124_v41  ;;  %v2726_v44 = vrot.slane %v5173_v36, 3 }
  0xd8   :  { %4159 = vmatpush3.bf16.msra.mxu0 %v4555_v28  ;;  %v2437_v28 = vrot.slane %v4991_v35, 3 }
  0xd9   :  { %4160 = vmatprep.subr.bf16.mxu0 %v4556_v4 }
  0xda   :  { %3905 = vmatmul.mubr.bf16.gmra.mrb[28].mxu1 %v838_v43  ;;  %v2444_v43 = vshll.u32 %v5229_v60, 16 }
  0xdb   :  { %4129 = vmatmul.mubr.bf16.gmra.mrb[12].mxu0 %v2411_v18  ;;  %3924 = vmatprep.mubr.bf16.mxu1 %v1115_v55  ;;  %v2438_v18 = vor.u32 %v2437_v28, %v2436_v56  ;;  %v4569_v55 = vld [vmem:[%s5633_s2 + $0x118] sm:$0xff]   ;;  %v5422_v56 = vld [vmem:[%s5634_s0 + $0x68] sm:$0xff]  }
  0xdc   :  { %4132 = vmatprep.mubr.bf16.mxu0 %v2415_v22  ;;  %4161 = vmatpush3.bf16.msra.mxu0 %v4556_v4  ;;  %v2441_v4 = vshrl.u32 %v5229_v60, 16  ;;  %v1127_v22 = vsel %vm1112_vm6, %v1124_v41, %v1126_v26  ;;  %v2446_v7 = vrot.slane %v2444_v43, 3  ;;  %v1138_v28 = vrot.slane %v5422_v56, 5 }
  0xdd   :  { %4162 = vmatprep.subr.bf16.mxu0 %v4557_v6  ;;  %v2732_v41 = vrot.slane %v5346_v40, 3  ;;  %v2734_v40 = vrot.slane %v5352_v3, 3 }
  0xde   :  { %v2443_v21 = vrot.slane %v2441_v4, 2 }
  0xe0   :  { %4163 = vmatpush3.bf16.msra.mxu0 %v4557_v6  ;;  %v2439_v6 = vsel %vm2376_vm3, %v2434_v52, %v2438_v18 }
  0xe2   :  { %3925 = vmatmul.mubr.bf16.vlgmr.msra.gmra.mrb[0].mxu1 %v1117_v5  ;;  %v5376_v5 = vld [vmem:[%s5634_s0 + $0x48] sm:$0xff]  }
  0xe3   :  { %4133 = vmatmul.mubr.bf16.gmra.mrb[16].mxu0 %v2419_v13  ;;  %4204 = vmatpush3.bf16.msra.mxu1 %v5263_v0  ;;  %v2427_v0 = vsel %vm2376_vm3, %v2422_v47, %v2426_v51  ;;  %v2447_v47 = vor.u32 %v2446_v7, %v2443_v21  ;;  %v1130_v13 = vrot.slane %v5376_v5, 5  ;;  %v1132_v51 = vrot.slane %v5394_v20, 5 }
  0xe4   :  { %3928 = vmatprep.mubr.bf16.mxu1 %v1119_v42  ;;  %4136 = vmatprep.mubr.bf16.mxu0 %v2423_v38  ;;  %v4573_v42 = vld [vmem:[%s5633_s2 + $0x128] sm:$0xff]   ;;  %v1129_v38 = vsel %vm1112_vm6, %v1126_v26, %v1128_v27  ;;  %v2735_v21 = vsel %vm2722_vm7, %v2732_v41, %v2734_v40 }
  0xe5   :  { %4197 = vmatprep.subr.bf16.mxu1 %v4565_v34  ;;  %v2448_v10 = vsel %vm2376_vm3, %v2438_v18, %v2447_v47  ;;  %v1131_v11 = vsel %vm1112_vm6, %v1128_v27, %v1130_v13  ;;  %v1144_v27 = vrot.slane %v4977_v63, 5 }
  0xe7   :  { %4205 = vmatpush3.bf16.msra.mxu1 %v4565_v34  ;;  %v5401_v34 = vld [vmem:[%s5634_s0 + $0x58] sm:$0xff]  }
  0xe8   :  { %4198 = vmatprep.subr.bf16.mxu1 %v4566_v61  ;;  %v1134_v50 = vrot.slane %v5401_v34, 5 }
  0xea   :  { %3929 = vmatmul.mubr.bf16.gmra.mrb[4].mxu1 %v1121_v45  ;;  %v2728_v45 = vrot.slane %v5194_v12, 3  ;;  %v1135_v36 = vsel %vm1112_vm6, %v1132_v51, %v1134_v50  ;;  %v5415_v12 = vld [vmem:[%s5634_s0 + $0x60] sm:$0xff]  }
  0xeb   :  { %4137 = vmatmul.mubr.bf16.gmra.mrb[20].mxu0 %v2427_v0  ;;  %3932 = vmatprep.mubr.bf16.mxu1 %v1123_v54  ;;  %v4577_v0 = vld [vmem:[%s5633_s2 + $0x138] sm:$0xff]   ;;  %v1133_v54 = vsel %vm1112_vm6, %v1130_v13, %v1132_v51  ;;  %v1136_v23 = vrot.slane %v5415_v12, 5  ;;  %v2740_v13 = vrot.slane %v5394_v20, 3  ;;  %v1467_v51 = vrot.slane %v4924_v1, 5 }
  0xec   :  { %4140 = vmatprep.mubr.bf16.mxu0 %v2431_v9  ;;  %4206 = vmatpush3.bf16.msra.mxu1 %v4566_v61  ;;  %v2727_v61 = vsel %vm2722_vm7, %v2724_v16, %v2726_v44  ;;  %v2729_v15 = vsel %vm2722_vm7, %v2726_v44, %v2728_v45  ;;  %v2730_v9 = vrot.slane %v5201_v29, 3  ;;  %v5433_v29 = vld [vmem:[%s5634_s0 + $0x70] sm:$0xff]   ;;  %v1459_v16 = vrot.slane %v4878_v30, 5 }
  0xed   :  { %4199 = vmatprep.subr.bf16.mxu1 %v4569_v55  ;;  %v1137_v52 = vsel %vm1112_vm6, %v1134_v50, %v1136_v23  ;;  %v1139_v4 = vsel %vm1112_vm6, %v1136_v23, %v1138_v28  ;;  %v1140_v18 = vrot.slane %v5433_v29, 5  ;;  %v2742_v30 = vrot.slane %v5401_v34, 3 }
  0xee   :  { %v2731_v26 = vsel %vm2722_vm7, %v2728_v45, %v2730_v9  ;;  %v2733_v43 = vsel %vm2722_vm7, %v2730_v9, %v2732_v41  ;;  %v1471_v50 = vrot.slane %v4958_v37, 5  ;;  %v1472_v45 = vrot.slane %v4927_v2, 6 }
  0xef   :  { %v1476_v37 = vrot.slane %v4954_v33, 6  ;;  %v1480_v23 = vrot.slane %v4966_v48, 6  ;;  %v4582_v33 = vld [vmem:[%s5635_s1 + $0x80] sm:$0xff]   ;;  %v1485_v48 = vrot.slane %v1483_v58, 5 }
  0xf0   :  { %4207 = vmatpush3.bf16.msra.mxu1 %v4569_v55  ;;  %v5440_v55 = vld [vmem:[%s5634_s0 + $0x78] sm:$0xff]   ;;  %v1473_v1 = vor.u32 %v1472_v45, %v1471_v50  ;;  %v2752_v41 = vrot.slane %v4582_v33, 3 }
  0xf1   :  { %4200 = vmatprep.subr.bf16.mxu1 %v4570_v8 }
  0xf2   :  { %3933 = vmatmul.mubr.bf16.gmra.mrb[8].mxu1 %v1125_v17  ;;  %v1142_v17 = vrot.slane %v5440_v55, 5 }
  0xf3   :  { %4141 = vmatmul.mubr.bf16.gmra.mrb[24].mxu0 %v2435_v49  ;;  %3936 = vmatprep.mubr.bf16.mxu1 %v1127_v22  ;;  %v2736_v49 = vrot.slane %v5370_v32, 3  ;;  %v1141_v22 = vsel %vm1112_vm6, %v1138_v28, %v1140_v18  ;;  %v2738_v32 = vrot.slane %v5376_v5, 3  ;;  %v2750_v28 = vrot.slane %v5440_v55, 3 }
  0xf4   :  { %4144 = vmatprep.mubr.bf16.mxu0 %v2439_v6  ;;  %4208 = vmatpush3.bf16.msra.mxu1 %v4570_v8  ;;  %v1143_v7 = vsel %vm1112_vm6, %v1140_v18, %v1142_v17  ;;  %v1455_v6 = vrot.slane %v4872_v25, 5  ;;  %v1456_v8 = vrot.slane %v4837_v62, 6  ;;  %v1145_v14 = vsel %vm1112_vm6, %v1142_v17, %v1144_v27 }
  0xf5   :  { %4201 = vmatprep.subr.bf16.mxu1 %v4573_v42  ;;  %v2737_v3 = vsel %vm2722_vm7, %v2734_v40, %v2736_v49  ;;  %v1460_v25 = vrot.slane %v4865_v19, 6  ;;  %v2739_v62 = vsel %vm2722_vm7, %v2736_v49, %v2738_v32  ;;  %v2741_v5 = vsel %vm2722_vm7, %v2738_v32, %v2740_v13 }
  0xf6   :  { %v1457_v47 = vor.u32 %v1456_v8, %v1455_v6  ;;  %v2744_v19 = vrot.slane %v5415_v12, 3  ;;  %v1479_v12 = vrot.slane %v4988_v24, 5  ;;  %v1486_v24 = vrot.slane %v4991_v35, 6 }
  0xf7   :  { %v2754_v18 = vrot.slane %v5229_v60, 3 }
  0xf8   :  { %4209 = vmatpush3.bf16.msra.mxu1 %v4573_v42  ;;  %v5641_v42 = vld [vmem:[#allocation2_spill] sm:$0xff] }
  0xf9   :  { %4202 = vmatprep.subr.bf16.mxu1 %v4574_v57  ;;  %v2755_v63 = vsel %vm2722_vm7, %v2752_v41, %v2754_v18 }
  0xfa   :  { %3937 = vmatmul.mubr.bf16.gmra.mrb[12].mxu1 %v1129_v38  ;;  %v1458_v38 = vsel %vm1419_vm1, %v5641_v42, %v1457_v47  ;;  %v5514_v42 = vld [vmem:[%s5637_s4] ss:$0 sm:$0xff] }
  0xfb   :  { %4145 = vmatmul.mubr.bf16.gmra.mrb[28].mxu0 %v2448_v10  ;;  %3940 = vmatprep.mubr.bf16.mxu1 %v1131_v11  ;;  %v1463_v10 = vrot.slane %v4919_v59, 5  ;;  %v1464_v11 = vrot.slane %v4881_v31, 6  ;;  %v1468_v59 = vrot.slane %v4910_v53, 6  ;;  %v2743_v31 = vsel %vm2722_vm7, %v2740_v13, %v2742_v30 }
  0xfc   :  { %4164 = vmatprep.mubr.bf16.mxu0 %v2725_v39  ;;  %4210 = vmatpush3.bf16.msra.mxu1 %v4574_v57  ;;  %v1461_v39 = vor.u32 %v1460_v25, %v1459_v16  ;;  %v2748_v53 = vrot.slane %v5433_v29, 3  ;;  %v1487_v29 = vor.u32 %v1486_v24, %v1485_v48  ;;  %v5509_v16 = vld [vmem:[%s5636_s3] ss:$0 sm:$0xff] }
  0xfd   :  { %4203 = vmatprep.subr.bf16.mxu1 %v4577_v0  ;;  %v1465_v57 = vor.u32 %v1464_v11, %v1463_v10  ;;  %v1469_v34 = vor.u32 %v1468_v59, %v1467_v51 }
  0xfe   :  { %v1462_v20 = vsel %vm1419_vm1, %v1457_v47, %v1461_v39 }
  0xff   :  { %v1466_v44 = vsel %vm1419_vm1, %v1461_v39, %v1465_v57 }
 0x100   :  { %4211 = vmatpush3.bf16.msra.mxu1 %v4577_v0  ;;  %v2745_v0 = vsel %vm2722_vm7, %v2742_v30, %v2744_v19 }
 0x102   :  { %3941 = vmatmul.mubr.bf16.gmra.mrb[16].mxu1 %v1133_v54  ;;  %v2746_v54 = vrot.slane %v5422_v56, 3 }
 0x103   :  { %4165 = vmatmul.mubr.bf16.vlgmr.msra.gmra.mrb[0].mxu0 %v2727_v61  ;;  %3944 = vmatprep.mubr.bf16.mxu1 %v1135_v36  ;;  %v1470_v61 = vsel %vm1419_vm1, %v1465_v57, %v1469_v34  ;;  %v1475_v36 = vrot.slane %v4963_v46, 5  ;;  %v1481_v46 = vor.u32 %v1480_v23, %v1479_v12 }
 0x104   :  { %4168 = vmatprep.mubr.bf16.mxu0 %v2729_v15  ;;  %v2747_v2 = vsel %vm2722_vm7, %v2744_v19, %v2746_v54  ;;  %v1474_v15 = vsel %vm1419_vm1, %v1469_v34, %v1473_v1  ;;  %v2749_v9 = vsel %vm2722_vm7, %v2746_v54, %v2748_v53 }
 0x105   :  { %v1477_v56 = vor.u32 %v1476_v37, %v1475_v36  ;;  %v1488_v40 = vsel %vm1419_vm1, %v1481_v46, %v1487_v29 }
 0x10a   :  { %3945 = vmatmul.mubr.bf16.gmra.mrb[20].mxu1 %v1137_v52  ;;  %v1478_v52 = vsel %vm1419_vm1, %v1473_v1, %v1477_v56 }
 0x10b   :  { %4169 = vmatmul.mubr.bf16.gmra.mrb[4].mxu0 %v2731_v26  ;;  %3948 = vmatprep.mubr.bf16.mxu1 %v1139_v4  ;;  %v2751_v26 = vsel %vm2722_vm7, %v2748_v53, %v2750_v28  ;;  %v1482_v4 = vsel %vm1419_vm1, %v1477_v56, %v1481_v46 }
 0x10c   :  { %4172 = vmatprep.mubr.bf16.mxu0 %v2733_v43  ;;  %v2753_v43 = vsel %vm2722_vm7, %v2750_v28, %v2752_v41 }
 0x112   :  { %3949 = vmatmul.mubr.bf16.gmra.mrb[24].mxu1 %v1141_v22 }
 0x113   :  { %4173 = vmatmul.mubr.bf16.gmra.mrb[8].mxu0 %v2735_v21  ;;  %3952 = vmatprep.mubr.bf16.mxu1 %v1143_v7 }
 0x114   :  { %4176 = vmatprep.mubr.bf16.mxu0 %v2737_v3 }
 0x11a   :  { %3953 = vmatmul.mubr.bf16.gmra.mrb[28].mxu1 %v1145_v14 }
 0x11b   :  { %4177 = vmatmul.mubr.bf16.gmra.mrb[12].mxu0 %v2739_v62  ;;  %3988 = vmatprep.mubr.bf16.mxu1 %v1458_v38 }
 0x11c   :  { %4180 = vmatprep.mubr.bf16.mxu0 %v2741_v5 }
 0x122   :  { %3989 = vmatmul.mubr.bf16.vlgmr.msra.gmra.mrb[16].mxu1 %v1462_v20 }
 0x123   :  { %4181 = vmatmul.mubr.bf16.gmra.mrb[16].mxu0 %v2743_v31  ;;  %3992 = vmatprep.mubr.bf16.mxu1 %v1466_v44 }
 0x124   :  { %4184 = vmatprep.mubr.bf16.mxu0 %v2745_v0 }
 0x12a   :  { %3993 = vmatmul.mubr.bf16.gmra.mrb[20].mxu1 %v1470_v61 }
 0x12b   :  { %4185 = vmatmul.mubr.bf16.gmra.mrb[20].mxu0 %v2747_v2  ;;  %3996 = vmatprep.mubr.bf16.mxu1 %v1474_v15 }
 0x12c   :  { %4188 = vmatprep.mubr.bf16.mxu0 %v2749_v9 }
 0x132   :  { %3997 = vmatmul.mubr.bf16.gmra.mrb[24].mxu1 %v1478_v52 }
 0x133   :  { %4189 = vmatmul.mubr.bf16.gmra.mrb[24].mxu0 %v2751_v26  ;;  %4000 = vmatprep.mubr.bf16.mxu1 %v1482_v4 }
 0x134   :  { %4192 = vmatprep.mubr.bf16.mxu0 %v2753_v43 }
 0x13a   :  { %4001 = vmatmul.mubr.bf16.gmra.mrb[28].mxu1 %v1488_v40 }
 0x13b   :  { %4193 = vmatmul.mubr.bf16.gmra.mrb[28].mxu0 %v2755_v63 }
 0x1b5   :  { %v3926_v35 = vpop.f32.mrb[0].mxu1 }
 0x1b6   :  { %v1244_v58 = vpop.f32.mrb[1].mxu1 }
 0x1b7   :  { %v3927_v55 = vpop.f32.mrb[2].mxu1 }
 0x1b8   :  { %v1247_v17 = vpop.f32.mrb[3].mxu1 }
 0x1bd   :  { %v3930_v49 = vpop.f32.mrb[4].mxu1 }
 0x1be   :  { %v1260_v22 = vpop.f32.mrb[5].mxu1 }
 0x1bf   :  { %v3931_v21 = vpop.f32.mrb[6].mxu1 }
 0x1c0   :  { %v1263_v7 = vpop.f32.mrb[7].mxu1 }
 0x1c5   :  { %v3934_v6 = vpop.f32.mrb[8].mxu1 }
 0x1c6   :  { %v1276_v8 = vpop.f32.mrb[9].mxu1 }
 0x1c7   :  { %v3935_v3 = vpop.f32.mrb[10].mxu1 }
 0x1c8   :  { %v5496_v27 = vpop.f32.mrb[11].mxu1 }
 0x1cd   :  { %v5498_v60 = vpop.f32.mrb[12].mxu1 }
 0x1ce   :  { %v5500_v32 = vpop.f32.mrb[13].mxu1 }
 0x1cf   :  { %v5502_v47 = vpop.f32.mrb[14].mxu1 }
 0x1d0   :  { %v5504_v13 = vpop.f32.mrb[15].mxu1 }
 0x1d6   :  { %v4166_v14 = vpop.f32.mrb[0].mxu0 }
 0x1d7   :  { %v4212_v25 = vadd.f32 %v4166_v14, %v3926_v35  ;;  %v2854_v62 = vpop.f32.mrb[1].mxu0 }
 0x1d8   :  { %v4213_v38 = vadd.f32 %v2854_v62, %v1244_v58  ;;  %v4167_v10 = vpop.f32.mrb[2].mxu0 }
 0x1d9   :  { %v3022_v11 = vmul.f32 %v4212_v25, %v5509_v16  ;;  %v4214_v5 = vadd.f32 %v4167_v10, %v3927_v55  ;;  %v2857_v39 = vpop.f32.mrb[3].mxu0 }
 0x1da   :  { %v3020_v30 = vmul.f32 %v4213_v38, %v5509_v16  ;;  %v4215_v57 = vadd.f32 %v2857_v39, %v1247_v17 }
 0x1db   :  { %v3061_v19 = vadd.f32 %v5514_v42, %v3022_v11  ;;  %v3023_v20 = vmul.f32 %v4214_v5, %v5509_v16 }
 0x1dc   :  { %v3059_v51 = vadd.f32 %v5514_v42, %v3020_v30  ;;  %v3021_v59 = vmul.f32 %v4215_v57, %v5509_v16 }
 0x1dd   :  { %v3062_v31 = vadd.f32 %v5514_v42, %v3023_v20  ;;  %v3093_v45 = vmax.f32 %v3061_v19, 0.0 }
 0x1de   :  { %v3060_v44 = vadd.f32 %v5514_v42, %v3021_v59  ;;  %v4170_v50 = vpop.f32.mrb[4].mxu0  ;;  %v3091_v1 = vmax.f32 %v3059_v51, 0.0 }
 0x1df   :  { %v3094_v0 = vmax.f32 %v3062_v31, 0.0  ;;  %v4216_v34 = vadd.f32 %v4170_v50, %v3930_v49  ;;  %v2870_v54 = vpop.f32.mrb[5].mxu0 }
 0x1e0   :  { %v3092_v53 = vmax.f32 %v3060_v44, 0.0  ;;  %v4217_v61 = vadd.f32 %v2870_v54, %v1260_v22  ;;  %v4171_v36 = vpop.f32.mrb[6].mxu0 }
 0x1e1   :  { %v3461_v37 = vpack.c.bf16 %v3094_v0, %v3093_v45  ;;  %v3026_v2 = vmul.f32 %v4216_v34, %v5509_v16  ;;  %v4218_v15 = vadd.f32 %v4171_v36, %v3931_v21  ;;  %v2873_v12 = vpop.f32.mrb[7].mxu0 }
 0x1e2   :  { %v3456_v23 = vpack.c.bf16 %v3092_v53, %v3091_v1  ;;  %v3024_v9 = vmul.f32 %v4217_v61, %v5509_v16  ;;  %v4219_v56 = vadd.f32 %v2873_v12, %v1263_v7 }
 0x1e3   :  { %3533 = vst [vmem:[%s5638_s5 + $0x8] sm:$0xff] %v3461_v37   ;;  %v3065_v28 = vadd.f32 %v5514_v42, %v3026_v2  ;;  %v3027_v46 = vmul.f32 %v4218_v15, %v5509_v16 }
 0x1e4   :  { %3457 = vst [vmem:[%s5638_s5] sm:$0xff] %v3456_v23   ;;  %v3063_v33 = vadd.f32 %v5514_v42, %v3024_v9  ;;  %v3025_v41 = vmul.f32 %v4219_v56, %v5509_v16 }
 0x1e5   :  { %v3066_v52 = vadd.f32 %v5514_v42, %v3027_v46  ;;  %v3097_v26 = vmax.f32 %v3065_v28, 0.0 }
 0x1e6   :  { %v3064_v48 = vadd.f32 %v5514_v42, %v3025_v41  ;;  %v4174_v24 = vpop.f32.mrb[8].mxu0  ;;  %v3095_v18 = vmax.f32 %v3063_v33, 0.0 }
 0x1e7   :  { %v3098_v4 = vmax.f32 %v3066_v52, 0.0  ;;  %v4220_v43 = vadd.f32 %v4174_v24, %v3934_v6  ;;  %v2886_v29 = vpop.f32.mrb[9].mxu0 }
 0x1e8   :  { %v3096_v40 = vmax.f32 %v3064_v48, 0.0  ;;  %v4221_v63 = vadd.f32 %v2886_v29, %v1276_v8  ;;  %v4175_v35 = vpop.f32.mrb[10].mxu0 }
 0x1e9   :  { %v3471_v58 = vpack.c.bf16 %v3098_v4, %v3097_v26  ;;  %v3030_v55 = vmul.f32 %v4220_v43, %v5509_v16  ;;  %v4222_v17 = vadd.f32 %v4175_v35, %v3935_v3  ;;  %v2889_v49 = vpop.f32.mrb[11].mxu0 }
 0x1ea   :  { %v3466_v22 = vpack.c.bf16 %v3096_v40, %v3095_v18  ;;  %v3028_v21 = vmul.f32 %v4221_v63, %v5509_v16  ;;  %v4223_v7 = vadd.f32 %v2889_v49, %v5496_v27 }
 0x1eb   :  { %3535 = vst [vmem:[%s5638_s5 + $0x18] sm:$0xff] %v3471_v58   ;;  %v3069_v6 = vadd.f32 %v5514_v42, %v3030_v55  ;;  %v3031_v14 = vmul.f32 %v4222_v17, %v5509_v16 }
 0x1ec   :  { %3534 = vst [vmem:[%s5638_s5 + $0x10] sm:$0xff] %v3466_v22   ;;  %v3067_v8 = vadd.f32 %v5514_v42, %v3028_v21  ;;  %v3029_v3 = vmul.f32 %v4223_v7, %v5509_v16 }
 0x1ed   :  { %v3070_v25 = vadd.f32 %v5514_v42, %v3031_v14  ;;  %v3101_v38 = vmax.f32 %v3069_v6, 0.0 }
 0x1ee   :  { %v3068_v27 = vadd.f32 %v5514_v42, %v3029_v3  ;;  %v4178_v62 = vpop.f32.mrb[12].mxu0  ;;  %v3099_v39 = vmax.f32 %v3067_v8, 0.0 }
 0x1ef   :  { %v3102_v10 = vmax.f32 %v3070_v25, 0.0  ;;  %v4224_v11 = vadd.f32 %v4178_v62, %v5498_v60  ;;  %v2902_v5 = vpop.f32.mrb[13].mxu0 }
 0x1f0   :  { %v3100_v30 = vmax.f32 %v3068_v27, 0.0  ;;  %v4225_v57 = vadd.f32 %v2902_v5, %v5500_v32  ;;  %v4179_v19 = vpop.f32.mrb[14].mxu0 }
 0x1f1   :  { %v3481_v20 = vpack.c.bf16 %v3102_v10, %v3101_v38  ;;  %v3034_v51 = vmul.f32 %v4224_v11, %v5509_v16  ;;  %v4226_v59 = vadd.f32 %v4179_v19, %v5502_v47  ;;  %v2905_v31 = vpop.f32.mrb[15].mxu0 }
 0x1f2   :  { %v3476_v44 = vpack.c.bf16 %v3100_v30, %v3099_v39  ;;  %v3032_v50 = vmul.f32 %v4225_v57, %v5509_v16  ;;  %v4227_v45 = vadd.f32 %v2905_v31, %v5504_v13 }
 0x1f3   :  { %3537 = vst [vmem:[%s5638_s5 + $0x28] sm:$0xff] %v3481_v20   ;;  %v3073_v60 = vadd.f32 %v5514_v42, %v3034_v51  ;;  %v3035_v32 = vmul.f32 %v4226_v59, %v5509_v16 }
 0x1f4   :  { %3536 = vst [vmem:[%s5638_s5 + $0x20] sm:$0xff] %v3476_v44   ;;  %v3071_v47 = vadd.f32 %v5514_v42, %v3032_v50  ;;  %v3033_v0 = vmul.f32 %v4227_v45, %v5509_v16 }
 0x1f5   :  { %v3074_v34 = vadd.f32 %v5514_v42, %v3035_v32  ;;  %v3990_v54 = vpop.f32.mrb[16].mxu1  ;;  %v3105_v61 = vmax.f32 %v3073_v60, 0.0 }
 0x1f6   :  { %v3072_v13 = vadd.f32 %v5514_v42, %v3033_v0  ;;  %v4182_v1 = vpop.f32.mrb[16].mxu0  ;;  %v1651_v53 = vpop.f32.mrb[17].mxu1  ;;  %v3103_v12 = vmax.f32 %v3071_v47, 0.0 }
 0x1f7   :  { %v3106_v36 = vmax.f32 %v3074_v34, 0.0  ;;  %v4228_v37 = vadd.f32 %v4182_v1, %v3990_v54  ;;  %v2918_v2 = vpop.f32.mrb[17].mxu0  ;;  %v3991_v15 = vpop.f32.mrb[18].mxu1 }
 0x1f8   :  { %v3104_v23 = vmax.f32 %v3072_v13, 0.0  ;;  %v4229_v9 = vadd.f32 %v2918_v2, %v1651_v53  ;;  %v4183_v56 = vpop.f32.mrb[18].mxu0  ;;  %v1654_v28 = vpop.f32.mrb[19].mxu1 }
 0x1f9   :  { %v3491_v46 = vpack.c.bf16 %v3106_v36, %v3105_v61  ;;  %v3038_v33 = vmul.f32 %v4228_v37, %v5509_v16  ;;  %v4230_v41 = vadd.f32 %v4183_v56, %v3991_v15  ;;  %v2921_v52 = vpop.f32.mrb[19].mxu0 }
 0x1fa   :  { %v3486_v48 = vpack.c.bf16 %v3104_v23, %v3103_v12  ;;  %v3036_v24 = vmul.f32 %v4229_v9, %v5509_v16  ;;  %v4231_v26 = vadd.f32 %v2921_v52, %v1654_v28 }
 0x1fb   :  { %3539 = vst [vmem:[%s5638_s5 + $0x38] sm:$0xff] %v3491_v46   ;;  %v3077_v4 = vadd.f32 %v5514_v42, %v3038_v33  ;;  %v3039_v43 = vmul.f32 %v4230_v41, %v5509_v16 }
 0x1fc   :  { %3538 = vst [vmem:[%s5638_s5 + $0x30] sm:$0xff] %v3486_v48   ;;  %v3075_v29 = vadd.f32 %v5514_v42, %v3036_v24  ;;  %v3037_v18 = vmul.f32 %v4231_v26, %v5509_v16 }
 0x1fd   :  { %v3078_v40 = vadd.f32 %v5514_v42, %v3039_v43  ;;  %v3994_v63 = vpop.f32.mrb[20].mxu1  ;;  %v3109_v17 = vmax.f32 %v3077_v4, 0.0 }
 0x1fe   :  { %v3076_v35 = vadd.f32 %v5514_v42, %v3037_v18  ;;  %v4186_v58 = vpop.f32.mrb[20].mxu0  ;;  %v1667_v55 = vpop.f32.mrb[21].mxu1  ;;  %v3107_v6 = vmax.f32 %v3075_v29, 0.0 }
 0x1ff   :  { %v3110_v49 = vmax.f32 %v3078_v40, 0.0  ;;  %v4232_v22 = vadd.f32 %v4186_v58, %v3994_v63  ;;  %v2934_v21 = vpop.f32.mrb[21].mxu0  ;;  %v3995_v7 = vpop.f32.mrb[22].mxu1 }
 0x200   :  { %v3108_v14 = vmax.f32 %v3076_v35, 0.0  ;;  %v4233_v8 = vadd.f32 %v2934_v21, %v1667_v55  ;;  %v4187_v3 = vpop.f32.mrb[22].mxu0  ;;  %v1670_v25 = vpop.f32.mrb[23].mxu1 }
 0x201   :  { %v3501_v27 = vpack.c.bf16 %v3110_v49, %v3109_v17  ;;  %v3042_v62 = vmul.f32 %v4232_v22, %v5509_v16  ;;  %v4234_v38 = vadd.f32 %v4187_v3, %v3995_v7  ;;  %v2937_v10 = vpop.f32.mrb[23].mxu0 }
 0x202   :  { %v3496_v11 = vpack.c.bf16 %v3108_v14, %v3107_v6  ;;  %v3040_v5 = vmul.f32 %v4233_v8, %v5509_v16  ;;  %v4235_v39 = vadd.f32 %v2937_v10, %v1670_v25 }
 0x203   :  { %3541 = vst [vmem:[%s5638_s5 + $0x48] sm:$0xff] %v3501_v27   ;;  %v3081_v30 = vadd.f32 %v5514_v42, %v3042_v62  ;;  %v3043_v57 = vmul.f32 %v4234_v38, %v5509_v16 }
 0x204   :  { %3540 = vst [vmem:[%s5638_s5 + $0x40] sm:$0xff] %v3496_v11   ;;  %v3079_v19 = vadd.f32 %v5514_v42, %v3040_v5  ;;  %v3041_v20 = vmul.f32 %v4235_v39, %v5509_v16 }
 0x205   :  { %v3082_v51 = vadd.f32 %v5514_v42, %v3043_v57  ;;  %v3998_v59 = vpop.f32.mrb[24].mxu1  ;;  %v3113_v45 = vmax.f32 %v3081_v30, 0.0 }
 0x206   :  { %v3080_v31 = vadd.f32 %v5514_v42, %v3041_v20  ;;  %v4190_v44 = vpop.f32.mrb[24].mxu0  ;;  %v1683_v50 = vpop.f32.mrb[25].mxu1  ;;  %v3111_v34 = vmax.f32 %v3079_v19, 0.0 }
 0x207   :  { %v3114_v60 = vmax.f32 %v3082_v51, 0.0  ;;  %v4236_v32 = vadd.f32 %v4190_v44, %v3998_v59  ;;  %v2950_v47 = vpop.f32.mrb[25].mxu0  ;;  %v3999_v0 = vpop.f32.mrb[26].mxu1 }
 0x208   :  { %v3112_v54 = vmax.f32 %v3080_v31, 0.0  ;;  %v4237_v13 = vadd.f32 %v2950_v47, %v1683_v50  ;;  %v4191_v1 = vpop.f32.mrb[26].mxu0  ;;  %v1686_v53 = vpop.f32.mrb[27].mxu1 }
 0x209   :  { %v3511_v61 = vpack.c.bf16 %v3114_v60, %v3113_v45  ;;  %v3046_v36 = vmul.f32 %v4236_v32, %v5509_v16  ;;  %v4238_v37 = vadd.f32 %v4191_v1, %v3999_v0  ;;  %v2953_v2 = vpop.f32.mrb[27].mxu0 }
 0x20a   :  { %v3506_v15 = vpack.c.bf16 %v3112_v54, %v3111_v34  ;;  %v3044_v12 = vmul.f32 %v4237_v13, %v5509_v16  ;;  %v4239_v23 = vadd.f32 %v2953_v2, %v1686_v53 }
 0x20b   :  { %3543 = vst [vmem:[%s5638_s5 + $0x58] sm:$0xff] %v3511_v61   ;;  %v3085_v9 = vadd.f32 %v5514_v42, %v3046_v36  ;;  %v3047_v56 = vmul.f32 %v4238_v37, %v5509_v16 }
 0x20c   :  { %3542 = vst [vmem:[%s5638_s5 + $0x50] sm:$0xff] %v3506_v15   ;;  %v3083_v28 = vadd.f32 %v5514_v42, %v3044_v12  ;;  %v3045_v46 = vmul.f32 %v4239_v23, %v5509_v16 }
 0x20d   :  { %v3086_v33 = vadd.f32 %v5514_v42, %v3047_v56  ;;  %v4002_v41 = vpop.f32.mrb[28].mxu1  ;;  %v3117_v26 = vmax.f32 %v3085_v9, 0.0 }
 0x20e   :  { %v3084_v52 = vadd.f32 %v5514_v42, %v3045_v46  ;;  %v4194_v48 = vpop.f32.mrb[28].mxu0  ;;  %v1699_v24 = vpop.f32.mrb[29].mxu1  ;;  %v3115_v40 = vmax.f32 %v3083_v28, 0.0 }
 0x20f   :  { %v3118_v4 = vmax.f32 %v3086_v33, 0.0  ;;  %v4240_v43 = vadd.f32 %v4194_v48, %v4002_v41  ;;  %v2966_v29 = vpop.f32.mrb[29].mxu0  ;;  %v4003_v18 = vpop.f32.mrb[30].mxu1 }
 0x210   :  { %v3116_v63 = vmax.f32 %v3084_v52, 0.0  ;;  %v4241_v35 = vadd.f32 %v2966_v29, %v1699_v24  ;;  %v4195_v58 = vpop.f32.mrb[30].mxu0  ;;  %v1702_v55 = vpop.f32.mrb[31].mxu1 }
 0x211   :  { %v3521_v17 = vpack.c.bf16 %v3118_v4, %v3117_v26  ;;  %v3050_v49 = vmul.f32 %v4240_v43, %v5509_v16  ;;  %v4242_v22 = vadd.f32 %v4195_v58, %v4003_v18  ;;  %v2969_v21 = vpop.f32.mrb[31].mxu0 }
 0x212   :  { %v3516_v7 = vpack.c.bf16 %v3116_v63, %v3115_v40  ;;  %v3048_v6 = vmul.f32 %v4241_v35, %v5509_v16  ;;  %v4243_v14 = vadd.f32 %v2969_v21, %v1702_v55 }
 0x213   :  { %3545 = vst [vmem:[%s5638_s5 + $0x68] sm:$0xff] %v3521_v17   ;;  %v3089_v8 = vadd.f32 %v5514_v42, %v3050_v49  ;;  %v3051_v3 = vmul.f32 %v4242_v22, %v5509_v16 }
 0x214   :  { %3544 = vst [vmem:[%s5638_s5 + $0x60] sm:$0xff] %v3516_v7   ;;  %v3087_v25 = vadd.f32 %v5514_v42, %v3048_v6  ;;  %v3049_v27 = vmul.f32 %v4243_v14, %v5509_v16 }
 0x215   :  { %v3090_v62 = vadd.f32 %v5514_v42, %v3051_v3  ;;  %v3121_v10 = vmax.f32 %v3089_v8, 0.0 }
 0x216   :  { %v3088_v38 = vadd.f32 %v5514_v42, %v3049_v27  ;;  %v3119_v5 = vmax.f32 %v3087_v25, 0.0 }
 0x217   :  { %v3122_v11 = vmax.f32 %v3090_v62, 0.0 }
 0x218   :  { %v3120_v39 = vmax.f32 %v3088_v38, 0.0 }
 0x219   :  { %v3531_v30 = vpack.c.bf16 %v3122_v11, %v3121_v10 }
 0x21a   :  { %v3526_v57 = vpack.c.bf16 %v3120_v39, %v3119_v5 }
 0x21b   :  { %3547 = vst [vmem:[%s5638_s5 + $0x78] sm:$0xff] %v3531_v30  }
 0x21c   :  { %3546 = vst [vmem:[%s5638_s5 + $0x70] sm:$0xff] %v3526_v57  }

</bundles_post_ra>
